<compile_context>
chip_gen: v5e
topology: v5e:2x2
jax: 0.10.0
libtpu: 0.0.40
codegen_flags: <defaults>
</compile_context>

<pallas_src>
import functools

import jax
import jax.numpy as jnp
from jax.experimental import pallas as pl
from jax.experimental.pallas import tpu as pltpu

LN_EPS = 1e-5  # nn.LayerNorm default eps (the module does not pass layer_norm_eps)


def _round_up(n, m):
    return ((n + m - 1) // m) * m


def _layernorm_relu(h, gamma, beta):
    """Single-pass LayerNorm (biased var = E[h^2] - mu^2) + ReLU, in f32."""
    mu = jnp.mean(h, axis=-1, keepdims=True)
    m2 = jnp.mean(h * h, axis=-1, keepdims=True)
    inv = jax.lax.rsqrt(jnp.maximum(m2 - mu * mu, 0.0) + LN_EPS)
    return jnp.maximum((h - mu) * inv * gamma + beta, 0.0)


def _msff_kernel(dims, x_ref, wcat_ref, bcat_ref, lng_ref, lnb_ref,
                 wfcat_ref, bf_ref, gf_ref, bff_ref, out_ref):
    L = len(dims)
    sum_d = sum(dims)

    x = x_ref[...]                                              # (tm, H)

    # --- MXU pass 1: all extraction levels + attention logits in one matmul ---
    hc = jnp.dot(x, wcat_ref[...], preferred_element_type=jnp.float32)
    hc = hc + bcat_ref[...]                                     # (tm, sum_d + L) f32

    # softmax over the L attention logits (f32, VPU/EUP)
    logits = hc[:, sum_d:sum_d + L]
    logits = logits - jnp.max(logits, axis=-1, keepdims=True)
    e = jnp.exp(logits)
    att = e / jnp.sum(e, axis=-1, keepdims=True)                # (tm, L)

    # per-level LayerNorm + ReLU on static lane slices, weighted by att
    lng = lng_ref[...]
    lnb = lnb_ref[...]
    weighted = []
    off = 0
    for i, d in enumerate(dims):
        f = _layernorm_relu(hc[:, off:off + d],
                            lng[:, off:off + d], lnb[:, off:off + d])
        weighted.append(f * att[:, i:i + 1])
        off += d
    g = jnp.concatenate(weighted, axis=-1)                      # (tm, sum_d) f32

    # --- MXU pass 2: fused (tm, sum_d) @ (sum_d, H) fusion matmul ---
    y = jnp.dot(g.astype(wfcat_ref.dtype), wfcat_ref[...],
                preferred_element_type=jnp.float32) + bf_ref[...]
    out_ref[...] = _layernorm_relu(y, gf_ref[...], bff_ref[...]).astype(out_ref.dtype)


def multi_scale_feature_fusion(x, params, num_levels, tm=256, use_bf16=False):
    """x: (B, S, H).  params: dict from init_params.  Returns (B, S, H)."""
    B, S, H = x.shape
    dims = [H // (2 ** i) for i in range(num_levels)]
    sum_d = sum(dims)
    L = num_levels
    out_dtype = x.dtype
    mxu_dtype = jnp.bfloat16 if use_bf16 else jnp.float32

    # ---- host-side weight packing: two wide matmuls instead of 2L+1 narrow ones ----
    wcat = jnp.concatenate(list(params["w_ext"]) + [params["wa"]], axis=1)      # (H, sum_d+L)
    bcat = jnp.concatenate([b.reshape(-1) for b in params["b_ext"]]
                           + [params["ba"].reshape(-1)]).reshape(1, sum_d + L)
    lng = jnp.concatenate([g.reshape(-1) for g in params["ln_g"]]).reshape(1, sum_d)
    lnb = jnp.concatenate([b.reshape(-1) for b in params["ln_b"]]).reshape(1, sum_d)
    wfcat = jnp.concatenate(list(params["wf"]), axis=0)                          # (sum_d, H)
    bf = params["bf"].reshape(1, H).astype(jnp.float32)
    gf = params["gf"].reshape(1, H).astype(jnp.float32)
    bff = params["bff"].reshape(1, H).astype(jnp.float32)

    wcat = wcat.astype(mxu_dtype)        # MXU operands (optionally bf16)
    wfcat = wfcat.astype(mxu_dtype)
    bcat = bcat.astype(jnp.float32)      # VPU operands stay f32
    lng = lng.astype(jnp.float32)
    lnb = lnb.astype(jnp.float32)

    # ---- row tiling: pad N up to a tile multiple instead of asserting ----
    tm = max(8, _round_up(tm, 8))
    N = B * S
    tm_eff = min(tm, _round_up(N, 8))
    n_pad = _round_up(N, tm_eff)
    xf = x.reshape(N, H).astype(mxu_dtype)
    if n_pad != N:
        xf = jnp.pad(xf, ((0, n_pad - N), (0, 0)))   # zero rows are LN-safe (eps > 0)
    grid = (n_pad // tm_eff,)

    # ---- VMEM budget: resident weights (double-buffer headroom) + I/O tiles ----
    w_bytes = (wcat.size + wfcat.size) * wcat.dtype.itemsize
    v_bytes = (bcat.size + lng.size + lnb.size + bf.size + gf.size + bff.size) * 4
    io_bytes = tm_eff * H * (xf.dtype.itemsize + jnp.dtype(out_dtype).itemsize)
    scratch_bytes = tm_eff * (sum_d + L) * 4 * 4
    vmem_limit = int(min(64 << 20,
                         max(32 << 20, 2 * (w_bytes + v_bytes + io_bytes) + scratch_bytes)))

    kernel = functools.partial(_msff_kernel, tuple(dims))
    inputs = (xf, wcat, bcat, lng, lnb, wfcat, bf, gf, bff)

    def build_in_specs(weight_kwargs):
        const = lambda shape: pl.BlockSpec(shape, lambda r: (0, 0), **weight_kwargs)
        return [
            pl.BlockSpec((tm_eff, H), lambda r: (r, 0)),   # x row tile
            const((H, sum_d + L)),                         # W_cat = [W_ext... | Wa]
            const((1, sum_d + L)),                         # b_cat
            const((1, sum_d)),                             # LN gamma (concat)
            const((1, sum_d)),                             # LN beta  (concat)
            const((sum_d, H)),                             # Wf_cat
            const((1, H)), const((1, H)), const((1, H)),   # bf, gamma_f, beta_f
        ]

    def run(weight_kwargs):
        out = pl.pallas_call(
            kernel,
            out_shape=jax.ShapeDtypeStruct((n_pad, H), out_dtype),
            grid_spec=pltpu.PrefetchScalarGridSpec(
                num_scalar_prefetch=0,
                grid=grid,
                in_specs=build_in_specs(weight_kwargs),
                out_specs=pl.BlockSpec((tm_eff, H), lambda r: (r, 0)),
            ),
            compiler_params=pltpu.CompilerParams(
                dimension_semantics=("parallel",),
                vmem_limit_bytes=vmem_limit,
            ),
        )(*inputs)
        return jax.block_until_ready(out)

    # Constant-index weights: request single-buffering (halves their VMEM
    # footprint on v7x); fall back transparently if unsupported.
    out = None
    if hasattr(pl, "Buffered"):
        try:
            out = run({"pipeline_mode": pl.Buffered(1)})
        except Exception:
            out = None
    if out is None:
        out = run({})

    return out[:N].reshape(B, S, H)


def reference(x, params, num_levels):
    """Pure-JAX reference mirroring the PyTorch forward (with explicit concat)."""
    att = jax.nn.softmax(x @ params["wa"] + params["ba"], axis=-1)
    feats = []
    for i in range(num_levels):
        h = x @ params["w_ext"][i] + params["b_ext"][i]
        mu = h.mean(-1, keepdims=True)
        var = ((h - mu) ** 2).mean(-1, keepdims=True)
        f = jax.nn.relu((h - mu) / jnp.sqrt(var + LN_EPS) * params["ln_g"][i] + params["ln_b"][i])
        feats.append(f * att[..., i:i + 1])
    concat = jnp.concatenate(feats, axis=-1)
    wf_full = jnp.concatenate(params["wf"], axis=0)  # (total_features, H)
    y = concat @ wf_full + params["bf"]
    mu = y.mean(-1, keepdims=True)
    var = ((y - mu) ** 2).mean(-1, keepdims=True)
    return jax.nn.relu((y - mu) / jnp.sqrt(var + LN_EPS) * params["gf"] + params["bff"])


def init_params(key, hidden_size, num_levels, initializer_range=0.02):
    dims = [hidden_size // (2 ** i) for i in range(num_levels)]
    # FIX: previous version split too few keys (4L+6) and hit StopIteration;
    # exactly 5L+5 keys are consumed below.
    keys = jax.random.split(key, 5 * num_levels + 5)
    k = iter(keys)
    p = {"w_ext": [], "b_ext": [], "ln_g": [], "ln_b": [], "wf": []}
    for d in dims:
        p["w_ext"].append(initializer_range * jax.random.normal(next(k), (hidden_size, d), jnp.float32))
        p["b_ext"].append(0.01 * jax.random.normal(next(k), (d,), jnp.float32))
        p["ln_g"].append(1.0 + 0.05 * jax.random.normal(next(k), (d,), jnp.float32))
        p["ln_b"].append(0.02 * jax.random.normal(next(k), (d,), jnp.float32))
    # fusion Linear: per-level row-slices of the (total_features, H) weight
    for d in dims:
        p["wf"].append(initializer_range * jax.random.normal(next(k), (d, hidden_size), jnp.float32))
    p["bf"] = 0.01 * jax.random.normal(next(k), (hidden_size,), jnp.float32)
    p["gf"] = 1.0 + 0.05 * jax.random.normal(next(k), (hidden_size,), jnp.float32)
    p["bff"] = 0.02 * jax.random.normal(next(k), (hidden_size,), jnp.float32)
    p["wa"] = initializer_range * jax.random.normal(next(k), (hidden_size, num_levels), jnp.float32)
    p["ba"] = 0.01 * jax.random.normal(next(k), (num_levels,), jnp.float32)
    return p


if __name__ == "__main__":
    B, S, H = 2, 8, 32      # small, consistent with (..., hidden_size) Linear stack
    NUM_LEVELS = 3          # level dims: 32, 16, 8

    key = jax.random.PRNGKey(0)
    kx, kp = jax.random.split(key)
    x = jax.random.normal(kx, (B, S, H), jnp.float32)
    params = init_params(kp, H, NUM_LEVELS)

    ref = reference(x, params, NUM_LEVELS)

    # f32 MXU path: tight tolerance against the pure-JAX reference.
    out = multi_scale_feature_fusion(x, params, NUM_LEVELS, tm=256)
    out = jax.block_until_ready(out)
    assert out.shape == (B, S, H)
    assert jnp.allclose(out, ref, atol=1e-4, rtol=1e-4), float(jnp.max(jnp.abs(out - ref)))

    # bf16-MXU perf path (LN/softmax stay f32): loose tolerance sanity check.
    out_bf16 = multi_scale_feature_fusion(x, params, NUM_LEVELS, tm=256, use_bf16=True)
    out_bf16 = jax.block_until_ready(out_bf16)
    assert out_bf16.shape == (B, S, H)
    assert jnp.allclose(out_bf16, ref, atol=0.15, rtol=0.15), float(jnp.max(jnp.abs(out_bf16 - ref)))

    print("KERNEL_OK")
</pallas_src>

<mosaic_0001>
module attributes {stable_mosaic.version = 11 : i64} {
  func.func @_msff_kernel(%arg0: i32, %arg1: memref<16x32xf32, #tpu.memory_space<vmem>>, %arg2: memref<32x59xf32, #tpu.memory_space<vmem>>, %arg3: memref<1x59xf32, #tpu.memory_space<vmem>>, %arg4: memref<1x56xf32, #tpu.memory_space<vmem>>, %arg5: memref<1x56xf32, #tpu.memory_space<vmem>>, %arg6: memref<56x32xf32, #tpu.memory_space<vmem>>, %arg7: memref<1x32xf32, #tpu.memory_space<vmem>>, %arg8: memref<1x32xf32, #tpu.memory_space<vmem>>, %arg9: memref<1x32xf32, #tpu.memory_space<vmem>>, %arg10: memref<16x32xf32, #tpu.memory_space<vmem>>) attributes {dimension_semantics = [#tpu.dimension_semantics<parallel>], iteration_bounds = array<i64: 1>, scalar_prefetch = 0 : i64, scratch_operands = 0 : i64, tpu.core_type = #tpu.core_type<tc>, window_params = [{transform_indices = @transform_0, window_bounds = array<i64: 16, 32>}, {pipeline_mode = #tpu.pipeline_mode<synchronous>, transform_indices = @transform_1, window_bounds = array<i64: 32, 59>}, {pipeline_mode = #tpu.pipeline_mode<synchronous>, transform_indices = @transform_2, window_bounds = array<i64: 1, 59>}, {pipeline_mode = #tpu.pipeline_mode<synchronous>, transform_indices = @transform_3, window_bounds = array<i64: 1, 56>}, {pipeline_mode = #tpu.pipeline_mode<synchronous>, transform_indices = @transform_4, window_bounds = array<i64: 1, 56>}, {pipeline_mode = #tpu.pipeline_mode<synchronous>, transform_indices = @transform_5, window_bounds = array<i64: 56, 32>}, {pipeline_mode = #tpu.pipeline_mode<synchronous>, transform_indices = @transform_6, window_bounds = array<i64: 1, 32>}, {pipeline_mode = #tpu.pipeline_mode<synchronous>, transform_indices = @transform_7, window_bounds = array<i64: 1, 32>}, {pipeline_mode = #tpu.pipeline_mode<synchronous>, transform_indices = @transform_8, window_bounds = array<i64: 1, 32>}, {transform_indices = @transform_9, window_bounds = array<i64: 16, 32>}]} {
    %c0 = arith.constant 0 : index
    %c0_0 = arith.constant 0 : index
    %0 = vector.load %arg1[%c0, %c0_0] : memref<16x32xf32, #tpu.memory_space<vmem>>, vector<16x32xf32>
    %c0_1 = arith.constant 0 : index
    %c0_2 = arith.constant 0 : index
    %1 = vector.load %arg2[%c0_1, %c0_2] : memref<32x59xf32, #tpu.memory_space<vmem>>, vector<32x59xf32>
    %cst = arith.constant dense<0.000000e+00> : vector<16x59xf32>
    %2 = tpu.matmul %0, %1, %cst {dimension_numbers = #tpu.dot_dimension_numbers<[1], [0], [0], [1], [0, 0, 1, 1], [], []>} : vector<16x32xf32>, vector<32x59xf32>, vector<16x59xf32> -> vector<16x59xf32>
    %c0_3 = arith.constant 0 : index
    %c0_4 = arith.constant 0 : index
    %3 = vector.load %arg3[%c0_3, %c0_4] : memref<1x59xf32, #tpu.memory_space<vmem>>, vector<1x59xf32>
    %4 = vector.broadcast %3 : vector<1x59xf32> to vector<16x59xf32>
    %5 = arith.addf %2, %4 : vector<16x59xf32>
    %6 = vector.extract_strided_slice %5 {offsets = [0, 56], sizes = [16, 3], strides = [1, 1]} : vector<16x59xf32> to vector<16x3xf32>
    %cst_5 = arith.constant dense<0xFF800000> : vector<16xf32>
    %7 = vector.multi_reduction <maximumf>, %6, %cst_5 [1] : vector<16x3xf32> to vector<16xf32>
    %8 = vector.shape_cast %7 : vector<16xf32> to vector<16x1xf32>
    %9 = vector.broadcast %8 : vector<16x1xf32> to vector<16x3xf32>
    %10 = arith.subf %6, %9 : vector<16x3xf32>
    %11 = math.exp %10 : vector<16x3xf32>
    %cst_6 = arith.constant dense<0.000000e+00> : vector<16xf32>
    %12 = vector.multi_reduction <add>, %11, %cst_6 [1] : vector<16x3xf32> to vector<16xf32>
    %13 = vector.shape_cast %12 : vector<16xf32> to vector<16x1xf32>
    %14 = vector.broadcast %13 : vector<16x1xf32> to vector<16x3xf32>
    %15 = arith.divf %11, %14 : vector<16x3xf32>
    %c0_7 = arith.constant 0 : index
    %c0_8 = arith.constant 0 : index
    %16 = vector.load %arg4[%c0_7, %c0_8] : memref<1x56xf32, #tpu.memory_space<vmem>>, vector<1x56xf32>
    %c0_9 = arith.constant 0 : index
    %c0_10 = arith.constant 0 : index
    %17 = vector.load %arg5[%c0_9, %c0_10] : memref<1x56xf32, #tpu.memory_space<vmem>>, vector<1x56xf32>
    %18 = vector.extract_strided_slice %5 {offsets = [0, 0], sizes = [16, 32], strides = [1, 1]} : vector<16x59xf32> to vector<16x32xf32>
    %19 = vector.extract_strided_slice %16 {offsets = [0, 0], sizes = [1, 32], strides = [1, 1]} : vector<1x56xf32> to vector<1x32xf32>
    %20 = vector.extract_strided_slice %17 {offsets = [0, 0], sizes = [1, 32], strides = [1, 1]} : vector<1x56xf32> to vector<1x32xf32>
    %cst_11 = arith.constant dense<0.000000e+00> : vector<16xf32>
    %21 = vector.multi_reduction <add>, %18, %cst_11 [1] : vector<16x32xf32> to vector<16xf32>
    %22 = vector.shape_cast %21 : vector<16xf32> to vector<16x1xf32>
    %cst_12 = arith.constant 3.200000e+01 : f32
    %23 = vector.broadcast %cst_12 : f32 to vector<16x1xf32>
    %24 = arith.divf %22, %23 : vector<16x1xf32>
    %25 = arith.mulf %18, %18 : vector<16x32xf32>
    %cst_13 = arith.constant dense<0.000000e+00> : vector<16xf32>
    %26 = vector.multi_reduction <add>, %25, %cst_13 [1] : vector<16x32xf32> to vector<16xf32>
    %27 = vector.shape_cast %26 : vector<16xf32> to vector<16x1xf32>
    %cst_14 = arith.constant 3.200000e+01 : f32
    %28 = vector.broadcast %cst_14 : f32 to vector<16x1xf32>
    %29 = arith.divf %27, %28 : vector<16x1xf32>
    %30 = arith.mulf %24, %24 : vector<16x1xf32>
    %31 = arith.subf %29, %30 : vector<16x1xf32>
    %cst_15 = arith.constant 0.000000e+00 : f32
    %32 = vector.broadcast %cst_15 : f32 to vector<16x1xf32>
    %33 = arith.maximumf %31, %32 : vector<16x1xf32>
    %cst_16 = arith.constant 9.99999974E-6 : f32
    %34 = vector.broadcast %cst_16 : f32 to vector<16x1xf32>
    %35 = arith.addf %33, %34 : vector<16x1xf32>
    %36 = math.rsqrt %35 : vector<16x1xf32>
    %37 = vector.broadcast %24 : vector<16x1xf32> to vector<16x32xf32>
    %38 = arith.subf %18, %37 : vector<16x32xf32>
    %39 = vector.broadcast %36 : vector<16x1xf32> to vector<16x32xf32>
    %40 = arith.mulf %38, %39 : vector<16x32xf32>
    %41 = vector.broadcast %19 : vector<1x32xf32> to vector<16x32xf32>
    %42 = arith.mulf %40, %41 : vector<16x32xf32>
    %43 = vector.broadcast %20 : vector<1x32xf32> to vector<16x32xf32>
    %44 = arith.addf %42, %43 : vector<16x32xf32>
    %cst_17 = arith.constant 0.000000e+00 : f32
    %45 = vector.broadcast %cst_17 : f32 to vector<16x32xf32>
    %46 = arith.maximumf %44, %45 : vector<16x32xf32>
    %47 = vector.extract_strided_slice %15 {offsets = [0, 0], sizes = [16, 1], strides = [1, 1]} : vector<16x3xf32> to vector<16x1xf32>
    %48 = vector.broadcast %47 : vector<16x1xf32> to vector<16x32xf32>
    %49 = arith.mulf %46, %48 : vector<16x32xf32>
    %50 = vector.extract_strided_slice %5 {offsets = [0, 32], sizes = [16, 16], strides = [1, 1]} : vector<16x59xf32> to vector<16x16xf32>
    %51 = vector.extract_strided_slice %16 {offsets = [0, 32], sizes = [1, 16], strides = [1, 1]} : vector<1x56xf32> to vector<1x16xf32>
    %52 = vector.extract_strided_slice %17 {offsets = [0, 32], sizes = [1, 16], strides = [1, 1]} : vector<1x56xf32> to vector<1x16xf32>
    %cst_18 = arith.constant dense<0.000000e+00> : vector<16xf32>
    %53 = vector.multi_reduction <add>, %50, %cst_18 [1] : vector<16x16xf32> to vector<16xf32>
    %54 = vector.shape_cast %53 : vector<16xf32> to vector<16x1xf32>
    %cst_19 = arith.constant 1.600000e+01 : f32
    %55 = vector.broadcast %cst_19 : f32 to vector<16x1xf32>
    %56 = arith.divf %54, %55 : vector<16x1xf32>
    %57 = arith.mulf %50, %50 : vector<16x16xf32>
    %cst_20 = arith.constant dense<0.000000e+00> : vector<16xf32>
    %58 = vector.multi_reduction <add>, %57, %cst_20 [1] : vector<16x16xf32> to vector<16xf32>
    %59 = vector.shape_cast %58 : vector<16xf32> to vector<16x1xf32>
    %cst_21 = arith.constant 1.600000e+01 : f32
    %60 = vector.broadcast %cst_21 : f32 to vector<16x1xf32>
    %61 = arith.divf %59, %60 : vector<16x1xf32>
    %62 = arith.mulf %56, %56 : vector<16x1xf32>
    %63 = arith.subf %61, %62 : vector<16x1xf32>
    %cst_22 = arith.constant 0.000000e+00 : f32
    %64 = vector.broadcast %cst_22 : f32 to vector<16x1xf32>
    %65 = arith.maximumf %63, %64 : vector<16x1xf32>
    %cst_23 = arith.constant 9.99999974E-6 : f32
    %66 = vector.broadcast %cst_23 : f32 to vector<16x1xf32>
    %67 = arith.addf %65, %66 : vector<16x1xf32>
    %68 = math.rsqrt %67 : vector<16x1xf32>
    %69 = vector.broadcast %56 : vector<16x1xf32> to vector<16x16xf32>
    %70 = arith.subf %50, %69 : vector<16x16xf32>
    %71 = vector.broadcast %68 : vector<16x1xf32> to vector<16x16xf32>
    %72 = arith.mulf %70, %71 : vector<16x16xf32>
    %73 = vector.broadcast %51 : vector<1x16xf32> to vector<16x16xf32>
    %74 = arith.mulf %72, %73 : vector<16x16xf32>
    %75 = vector.broadcast %52 : vector<1x16xf32> to vector<16x16xf32>
    %76 = arith.addf %74, %75 : vector<16x16xf32>
    %cst_24 = arith.constant 0.000000e+00 : f32
    %77 = vector.broadcast %cst_24 : f32 to vector<16x16xf32>
    %78 = arith.maximumf %76, %77 : vector<16x16xf32>
    %79 = vector.extract_strided_slice %15 {offsets = [0, 1], sizes = [16, 1], strides = [1, 1]} : vector<16x3xf32> to vector<16x1xf32>
    %80 = vector.broadcast %79 : vector<16x1xf32> to vector<16x16xf32>
    %81 = arith.mulf %78, %80 : vector<16x16xf32>
    %82 = vector.extract_strided_slice %5 {offsets = [0, 48], sizes = [16, 8], strides = [1, 1]} : vector<16x59xf32> to vector<16x8xf32>
    %83 = vector.extract_strided_slice %16 {offsets = [0, 48], sizes = [1, 8], strides = [1, 1]} : vector<1x56xf32> to vector<1x8xf32>
    %84 = vector.extract_strided_slice %17 {offsets = [0, 48], sizes = [1, 8], strides = [1, 1]} : vector<1x56xf32> to vector<1x8xf32>
    %cst_25 = arith.constant dense<0.000000e+00> : vector<16xf32>
    %85 = vector.multi_reduction <add>, %82, %cst_25 [1] : vector<16x8xf32> to vector<16xf32>
    %86 = vector.shape_cast %85 : vector<16xf32> to vector<16x1xf32>
    %cst_26 = arith.constant 8.000000e+00 : f32
    %87 = vector.broadcast %cst_26 : f32 to vector<16x1xf32>
    %88 = arith.divf %86, %87 : vector<16x1xf32>
    %89 = arith.mulf %82, %82 : vector<16x8xf32>
    %cst_27 = arith.constant dense<0.000000e+00> : vector<16xf32>
    %90 = vector.multi_reduction <add>, %89, %cst_27 [1] : vector<16x8xf32> to vector<16xf32>
    %91 = vector.shape_cast %90 : vector<16xf32> to vector<16x1xf32>
    %cst_28 = arith.constant 8.000000e+00 : f32
    %92 = vector.broadcast %cst_28 : f32 to vector<16x1xf32>
    %93 = arith.divf %91, %92 : vector<16x1xf32>
    %94 = arith.mulf %88, %88 : vector<16x1xf32>
    %95 = arith.subf %93, %94 : vector<16x1xf32>
    %cst_29 = arith.constant 0.000000e+00 : f32
    %96 = vector.broadcast %cst_29 : f32 to vector<16x1xf32>
    %97 = arith.maximumf %95, %96 : vector<16x1xf32>
    %cst_30 = arith.constant 9.99999974E-6 : f32
    %98 = vector.broadcast %cst_30 : f32 to vector<16x1xf32>
    %99 = arith.addf %97, %98 : vector<16x1xf32>
    %100 = math.rsqrt %99 : vector<16x1xf32>
    %101 = vector.broadcast %88 : vector<16x1xf32> to vector<16x8xf32>
    %102 = arith.subf %82, %101 : vector<16x8xf32>
    %103 = vector.broadcast %100 : vector<16x1xf32> to vector<16x8xf32>
    %104 = arith.mulf %102, %103 : vector<16x8xf32>
    %105 = vector.broadcast %83 : vector<1x8xf32> to vector<16x8xf32>
    %106 = arith.mulf %104, %105 : vector<16x8xf32>
    %107 = vector.broadcast %84 : vector<1x8xf32> to vector<16x8xf32>
    %108 = arith.addf %106, %107 : vector<16x8xf32>
    %cst_31 = arith.constant 0.000000e+00 : f32
    %109 = vector.broadcast %cst_31 : f32 to vector<16x8xf32>
    %110 = arith.maximumf %108, %109 : vector<16x8xf32>
    %111 = vector.extract_strided_slice %15 {offsets = [0, 2], sizes = [16, 1], strides = [1, 1]} : vector<16x3xf32> to vector<16x1xf32>
    %112 = vector.broadcast %111 : vector<16x1xf32> to vector<16x8xf32>
    %113 = arith.mulf %110, %112 : vector<16x8xf32>
    %114 = tpu.concatenate %49, %81, %113 in 1 : vector<16x32xf32>, vector<16x16xf32>, vector<16x8xf32> -> vector<16x56xf32>
    %c0_32 = arith.constant 0 : index
    %c0_33 = arith.constant 0 : index
    %115 = vector.load %arg6[%c0_32, %c0_33] : memref<56x32xf32, #tpu.memory_space<vmem>>, vector<56x32xf32>
    %cst_34 = arith.constant dense<0.000000e+00> : vector<16x32xf32>
    %116 = tpu.matmul %114, %115, %cst_34 {dimension_numbers = #tpu.dot_dimension_numbers<[1], [0], [0], [1], [0, 0, 1, 1], [], []>} : vector<16x56xf32>, vector<56x32xf32>, vector<16x32xf32> -> vector<16x32xf32>
    %c0_35 = arith.constant 0 : index
    %c0_36 = arith.constant 0 : index
    %117 = vector.load %arg7[%c0_35, %c0_36] : memref<1x32xf32, #tpu.memory_space<vmem>>, vector<1x32xf32>
    %118 = vector.broadcast %117 : vector<1x32xf32> to vector<16x32xf32>
    %119 = arith.addf %116, %118 : vector<16x32xf32>
    %c0_37 = arith.constant 0 : index
    %c0_38 = arith.constant 0 : index
    %120 = vector.load %arg8[%c0_37, %c0_38] : memref<1x32xf32, #tpu.memory_space<vmem>>, vector<1x32xf32>
    %c0_39 = arith.constant 0 : index
    %c0_40 = arith.constant 0 : index
    %121 = vector.load %arg9[%c0_39, %c0_40] : memref<1x32xf32, #tpu.memory_space<vmem>>, vector<1x32xf32>
    %cst_41 = arith.constant dense<0.000000e+00> : vector<16xf32>
    %122 = vector.multi_reduction <add>, %119, %cst_41 [1] : vector<16x32xf32> to vector<16xf32>
    %123 = vector.shape_cast %122 : vector<16xf32> to vector<16x1xf32>
    %cst_42 = arith.constant 3.200000e+01 : f32
    %124 = vector.broadcast %cst_42 : f32 to vector<16x1xf32>
    %125 = arith.divf %123, %124 : vector<16x1xf32>
    %126 = arith.mulf %119, %119 : vector<16x32xf32>
    %cst_43 = arith.constant dense<0.000000e+00> : vector<16xf32>
    %127 = vector.multi_reduction <add>, %126, %cst_43 [1] : vector<16x32xf32> to vector<16xf32>
    %128 = vector.shape_cast %127 : vector<16xf32> to vector<16x1xf32>
    %cst_44 = arith.constant 3.200000e+01 : f32
    %129 = vector.broadcast %cst_44 : f32 to vector<16x1xf32>
    %130 = arith.divf %128, %129 : vector<16x1xf32>
    %131 = arith.mulf %125, %125 : vector<16x1xf32>
    %132 = arith.subf %130, %131 : vector<16x1xf32>
    %cst_45 = arith.constant 0.000000e+00 : f32
    %133 = vector.broadcast %cst_45 : f32 to vector<16x1xf32>
    %134 = arith.maximumf %132, %133 : vector<16x1xf32>
    %cst_46 = arith.constant 9.99999974E-6 : f32
    %135 = vector.broadcast %cst_46 : f32 to vector<16x1xf32>
    %136 = arith.addf %134, %135 : vector<16x1xf32>
    %137 = math.rsqrt %136 : vector<16x1xf32>
    %138 = vector.broadcast %125 : vector<16x1xf32> to vector<16x32xf32>
    %139 = arith.subf %119, %138 : vector<16x32xf32>
    %140 = vector.broadcast %137 : vector<16x1xf32> to vector<16x32xf32>
    %141 = arith.mulf %139, %140 : vector<16x32xf32>
    %142 = vector.broadcast %120 : vector<1x32xf32> to vector<16x32xf32>
    %143 = arith.mulf %141, %142 : vector<16x32xf32>
    %144 = vector.broadcast %121 : vector<1x32xf32> to vector<16x32xf32>
    %145 = arith.addf %143, %144 : vector<16x32xf32>
    %cst_47 = arith.constant 0.000000e+00 : f32
    %146 = vector.broadcast %cst_47 : f32 to vector<16x32xf32>
    %147 = arith.maximumf %145, %146 : vector<16x32xf32>
    %c0_48 = arith.constant 0 : index
    %c0_49 = arith.constant 0 : index
    %148 = vector.load %arg10[%c0_48, %c0_49] : memref<16x32xf32, #tpu.memory_space<vmem>>, vector<16x32xf32>
    tpu.vector_store %arg10[%c0_48, %c0_49], %147 {strides = array<i32>} : memref<16x32xf32, #tpu.memory_space<vmem>>, vector<16x32xf32>,
    return
  }
  func.func @transform_0(%arg0: i32) -> (i32, i32) {
    %c0_i32 = arith.constant 0 : i32
    %c0_i32_0 = arith.constant 0 : i32
    return %arg0, %c0_i32 : i32, i32
  }
  func.func @transform_1(%arg0: i32) -> (i32, i32) {
    %c0_i32 = arith.constant 0 : i32
    %c0_i32_0 = arith.constant 0 : i32
    %c0_i32_1 = arith.constant 0 : i32
    return %c0_i32, %c0_i32_0 : i32, i32
  }
  func.func @transform_2(%arg0: i32) -> (i32, i32) {
    %c0_i32 = arith.constant 0 : i32
    %c0_i32_0 = arith.constant 0 : i32
    %c0_i32_1 = arith.constant 0 : i32
    return %c0_i32, %c0_i32_0 : i32, i32
  }
  func.func @transform_3(%arg0: i32) -> (i32, i32) {
    %c0_i32 = arith.constant 0 : i32
    %c0_i32_0 = arith.constant 0 : i32
    %c0_i32_1 = arith.constant 0 : i32
    return %c0_i32, %c0_i32_0 : i32, i32
  }
  func.func @transform_4(%arg0: i32) -> (i32, i32) {
    %c0_i32 = arith.constant 0 : i32
    %c0_i32_0 = arith.constant 0 : i32
    %c0_i32_1 = arith.constant 0 : i32
    return %c0_i32, %c0_i32_0 : i32, i32
  }
  func.func @transform_5(%arg0: i32) -> (i32, i32) {
    %c0_i32 = arith.constant 0 : i32
    %c0_i32_0 = arith.constant 0 : i32
    %c0_i32_1 = arith.constant 0 : i32
    return %c0_i32, %c0_i32_0 : i32, i32
  }
  func.func @transform_6(%arg0: i32) -> (i32, i32) {
    %c0_i32 = arith.constant 0 : i32
    %c0_i32_0 = arith.constant 0 : i32
    %c0_i32_1 = arith.constant 0 : i32
    return %c0_i32, %c0_i32_0 : i32, i32
  }
  func.func @transform_7(%arg0: i32) -> (i32, i32) {
    %c0_i32 = arith.constant 0 : i32
    %c0_i32_0 = arith.constant 0 : i32
    %c0_i32_1 = arith.constant 0 : i32
    return %c0_i32, %c0_i32_0 : i32, i32
  }
  func.func @transform_8(%arg0: i32) -> (i32, i32) {
    %c0_i32 = arith.constant 0 : i32
    %c0_i32_0 = arith.constant 0 : i32
    %c0_i32_1 = arith.constant 0 : i32
    return %c0_i32, %c0_i32_0 : i32, i32
  }
  func.func @transform_9(%arg0: i32) -> (i32, i32) {
    %c0_i32 = arith.constant 0 : i32
    %c0_i32_0 = arith.constant 0 : i32
    return %arg0, %c0_i32 : i32, i32
  }
}

module attributes {stable_mosaic.version = 11 : i64} {
  func.func @_msff_kernel(%arg0: i32, %arg1: memref<16x32xf32, #tpu.memory_space<vmem>>, %arg2: memref<32x59xf32, #tpu.memory_space<vmem>>, %arg3: memref<1x59xf32, #tpu.memory_space<vmem>>, %arg4: memref<1x56xf32, #tpu.memory_space<vmem>>, %arg5: memref<1x56xf32, #tpu.memory_space<vmem>>, %arg6: memref<56x32xf32, #tpu.memory_space<vmem>>, %arg7: memref<1x32xf32, #tpu.memory_space<vmem>>, %arg8: memref<1x32xf32, #tpu.memory_space<vmem>>, %arg9: memref<1x32xf32, #tpu.memory_space<vmem>>, %arg10: memref<16x32xf32, #tpu.memory_space<vmem>>) attributes {dimension_semantics = [#tpu.dimension_semantics<parallel>], iteration_bounds = array<i64: 1>, scalar_prefetch = 0 : i64, scratch_operands = 0 : i64, tpu.core_type = #tpu.core_type<tc>, window_params = [{transform_indices = @transform_0, window_bounds = array<i64: 16, 32>}, {pipeline_mode = #tpu.pipeline_mode<synchronous>, transform_indices = @transform_1, window_bounds = array<i64: 32, 59>}, {pipeline_mode = #tpu.pipeline_mode<synchronous>, transform_indices = @transform_2, window_bounds = array<i64: 1, 59>}, {pipeline_mode = #tpu.pipeline_mode<synchronous>, transform_indices = @transform_3, window_bounds = array<i64: 1, 56>}, {pipeline_mode = #tpu.pipeline_mode<synchronous>, transform_indices = @transform_4, window_bounds = array<i64: 1, 56>}, {pipeline_mode = #tpu.pipeline_mode<synchronous>, transform_indices = @transform_5, window_bounds = array<i64: 56, 32>}, {pipeline_mode = #tpu.pipeline_mode<synchronous>, transform_indices = @transform_6, window_bounds = array<i64: 1, 32>}, {pipeline_mode = #tpu.pipeline_mode<synchronous>, transform_indices = @transform_7, window_bounds = array<i64: 1, 32>}, {pipeline_mode = #tpu.pipeline_mode<synchronous>, transform_indices = @transform_8, window_bounds = array<i64: 1, 32>}, {transform_indices = @transform_9, window_bounds = array<i64: 16, 32>}]} {
    %c0 = arith.constant 0 : index
    %c0_0 = arith.constant 0 : index
    %0 = vector.load %arg1[%c0, %c0_0] : memref<16x32xf32, #tpu.memory_space<vmem>>, vector<16x32xf32>
    %c0_1 = arith.constant 0 : index
    %c0_2 = arith.constant 0 : index
    %1 = vector.load %arg2[%c0_1, %c0_2] : memref<32x59xf32, #tpu.memory_space<vmem>>, vector<32x59xf32>
    %cst = arith.constant dense<0.000000e+00> : vector<16x59xf32>
    %2 = tpu.matmul %0, %1, %cst {dimension_numbers = #tpu.dot_dimension_numbers<[1], [0], [0], [1], [0, 0, 1, 1], [], []>} : vector<16x32xf32>, vector<32x59xf32>, vector<16x59xf32> -> vector<16x59xf32>
    %c0_3 = arith.constant 0 : index
    %c0_4 = arith.constant 0 : index
    %3 = vector.load %arg3[%c0_3, %c0_4] : memref<1x59xf32, #tpu.memory_space<vmem>>, vector<1x59xf32>
    %4 = vector.broadcast %3 : vector<1x59xf32> to vector<16x59xf32>
    %5 = arith.addf %2, %4 : vector<16x59xf32>
    %6 = vector.extract_strided_slice %5 {offsets = [0, 56], sizes = [16, 3], strides = [1, 1]} : vector<16x59xf32> to vector<16x3xf32>
    %cst_5 = arith.constant dense<0xFF800000> : vector<16xf32>
    %7 = vector.multi_reduction <maximumf>, %6, %cst_5 [1] : vector<16x3xf32> to vector<16xf32>
    %8 = vector.shape_cast %7 : vector<16xf32> to vector<16x1xf32>
    %9 = vector.broadcast %8 : vector<16x1xf32> to vector<16x3xf32>
    %10 = arith.subf %6, %9 : vector<16x3xf32>
    %11 = math.exp %10 : vector<16x3xf32>
    %cst_6 = arith.constant dense<0.000000e+00> : vector<16xf32>
    %12 = vector.multi_reduction <add>, %11, %cst_6 [1] : vector<16x3xf32> to vector<16xf32>
    %13 = vector.shape_cast %12 : vector<16xf32> to vector<16x1xf32>
    %14 = vector.broadcast %13 : vector<16x1xf32> to vector<16x3xf32>
    %15 = arith.divf %11, %14 : vector<16x3xf32>
    %c0_7 = arith.constant 0 : index
    %c0_8 = arith.constant 0 : index
    %16 = vector.load %arg4[%c0_7, %c0_8] : memref<1x56xf32, #tpu.memory_space<vmem>>, vector<1x56xf32>
    %c0_9 = arith.constant 0 : index
    %c0_10 = arith.constant 0 : index
    %17 = vector.load %arg5[%c0_9, %c0_10] : memref<1x56xf32, #tpu.memory_space<vmem>>, vector<1x56xf32>
    %18 = vector.extract_strided_slice %5 {offsets = [0, 0], sizes = [16, 32], strides = [1, 1]} : vector<16x59xf32> to vector<16x32xf32>
    %19 = vector.extract_strided_slice %16 {offsets = [0, 0], sizes = [1, 32], strides = [1, 1]} : vector<1x56xf32> to vector<1x32xf32>
    %20 = vector.extract_strided_slice %17 {offsets = [0, 0], sizes = [1, 32], strides = [1, 1]} : vector<1x56xf32> to vector<1x32xf32>
    %cst_11 = arith.constant dense<0.000000e+00> : vector<16xf32>
    %21 = vector.multi_reduction <add>, %18, %cst_11 [1] : vector<16x32xf32> to vector<16xf32>
    %22 = vector.shape_cast %21 : vector<16xf32> to vector<16x1xf32>
    %cst_12 = arith.constant 3.200000e+01 : f32
    %23 = vector.broadcast %cst_12 : f32 to vector<16x1xf32>
    %24 = arith.divf %22, %23 : vector<16x1xf32>
    %25 = arith.mulf %18, %18 : vector<16x32xf32>
    %cst_13 = arith.constant dense<0.000000e+00> : vector<16xf32>
    %26 = vector.multi_reduction <add>, %25, %cst_13 [1] : vector<16x32xf32> to vector<16xf32>
    %27 = vector.shape_cast %26 : vector<16xf32> to vector<16x1xf32>
    %cst_14 = arith.constant 3.200000e+01 : f32
    %28 = vector.broadcast %cst_14 : f32 to vector<16x1xf32>
    %29 = arith.divf %27, %28 : vector<16x1xf32>
    %30 = arith.mulf %24, %24 : vector<16x1xf32>
    %31 = arith.subf %29, %30 : vector<16x1xf32>
    %cst_15 = arith.constant 0.000000e+00 : f32
    %32 = vector.broadcast %cst_15 : f32 to vector<16x1xf32>
    %33 = arith.maximumf %31, %32 : vector<16x1xf32>
    %cst_16 = arith.constant 9.99999974E-6 : f32
    %34 = vector.broadcast %cst_16 : f32 to vector<16x1xf32>
    %35 = arith.addf %33, %34 : vector<16x1xf32>
    %36 = math.rsqrt %35 : vector<16x1xf32>
    %37 = vector.broadcast %24 : vector<16x1xf32> to vector<16x32xf32>
    %38 = arith.subf %18, %37 : vector<16x32xf32>
    %39 = vector.broadcast %36 : vector<16x1xf32> to vector<16x32xf32>
    %40 = arith.mulf %38, %39 : vector<16x32xf32>
    %41 = vector.broadcast %19 : vector<1x32xf32> to vector<16x32xf32>
    %42 = arith.mulf %40, %41 : vector<16x32xf32>
    %43 = vector.broadcast %20 : vector<1x32xf32> to vector<16x32xf32>
    %44 = arith.addf %42, %43 : vector<16x32xf32>
    %cst_17 = arith.constant 0.000000e+00 : f32
    %45 = vector.broadcast %cst_17 : f32 to vector<16x32xf32>
    %46 = arith.maximumf %44, %45 : vector<16x32xf32>
    %47 = vector.extract_strided_slice %15 {offsets = [0, 0], sizes = [16, 1], strides = [1, 1]} : vector<16x3xf32> to vector<16x1xf32>
    %48 = vector.broadcast %47 : vector<16x1xf32> to vector<16x32xf32>
    %49 = arith.mulf %46, %48 : vector<16x32xf32>
    %50 = vector.extract_strided_slice %5 {offsets = [0, 32], sizes = [16, 16], strides = [1, 1]} : vector<16x59xf32> to vector<16x16xf32>
    %51 = vector.extract_strided_slice %16 {offsets = [0, 32], sizes = [1, 16], strides = [1, 1]} : vector<1x56xf32> to vector<1x16xf32>
    %52 = vector.extract_strided_slice %17 {offsets = [0, 32], sizes = [1, 16], strides = [1, 1]} : vector<1x56xf32> to vector<1x16xf32>
    %cst_18 = arith.constant dense<0.000000e+00> : vector<16xf32>
    %53 = vector.multi_reduction <add>, %50, %cst_18 [1] : vector<16x16xf32> to vector<16xf32>
    %54 = vector.shape_cast %53 : vector<16xf32> to vector<16x1xf32>
    %cst_19 = arith.constant 1.600000e+01 : f32
    %55 = vector.broadcast %cst_19 : f32 to vector<16x1xf32>
    %56 = arith.divf %54, %55 : vector<16x1xf32>
    %57 = arith.mulf %50, %50 : vector<16x16xf32>
    %cst_20 = arith.constant dense<0.000000e+00> : vector<16xf32>
    %58 = vector.multi_reduction <add>, %57, %cst_20 [1] : vector<16x16xf32> to vector<16xf32>
    %59 = vector.shape_cast %58 : vector<16xf32> to vector<16x1xf32>
    %cst_21 = arith.constant 1.600000e+01 : f32
    %60 = vector.broadcast %cst_21 : f32 to vector<16x1xf32>
    %61 = arith.divf %59, %60 : vector<16x1xf32>
    %62 = arith.mulf %56, %56 : vector<16x1xf32>
    %63 = arith.subf %61, %62 : vector<16x1xf32>
    %cst_22 = arith.constant 0.000000e+00 : f32
    %64 = vector.broadcast %cst_22 : f32 to vector<16x1xf32>
    %65 = arith.maximumf %63, %64 : vector<16x1xf32>
    %cst_23 = arith.constant 9.99999974E-6 : f32
    %66 = vector.broadcast %cst_23 : f32 to vector<16x1xf32>
    %67 = arith.addf %65, %66 : vector<16x1xf32>
    %68 = math.rsqrt %67 : vector<16x1xf32>
    %69 = vector.broadcast %56 : vector<16x1xf32> to vector<16x16xf32>
    %70 = arith.subf %50, %69 : vector<16x16xf32>
    %71 = vector.broadcast %68 : vector<16x1xf32> to vector<16x16xf32>
    %72 = arith.mulf %70, %71 : vector<16x16xf32>
    %73 = vector.broadcast %51 : vector<1x16xf32> to vector<16x16xf32>
    %74 = arith.mulf %72, %73 : vector<16x16xf32>
    %75 = vector.broadcast %52 : vector<1x16xf32> to vector<16x16xf32>
    %76 = arith.addf %74, %75 : vector<16x16xf32>
    %cst_24 = arith.constant 0.000000e+00 : f32
    %77 = vector.broadcast %cst_24 : f32 to vector<16x16xf32>
    %78 = arith.maximumf %76, %77 : vector<16x16xf32>
    %79 = vector.extract_strided_slice %15 {offsets = [0, 1], sizes = [16, 1], strides = [1, 1]} : vector<16x3xf32> to vector<16x1xf32>
    %80 = vector.broadcast %79 : vector<16x1xf32> to vector<16x16xf32>
    %81 = arith.mulf %78, %80 : vector<16x16xf32>
    %82 = vector.extract_strided_slice %5 {offsets = [0, 48], sizes = [16, 8], strides = [1, 1]} : vector<16x59xf32> to vector<16x8xf32>
    %83 = vector.extract_strided_slice %16 {offsets = [0, 48], sizes = [1, 8], strides = [1, 1]} : vector<1x56xf32> to vector<1x8xf32>
    %84 = vector.extract_strided_slice %17 {offsets = [0, 48], sizes = [1, 8], strides = [1, 1]} : vector<1x56xf32> to vector<1x8xf32>
    %cst_25 = arith.constant dense<0.000000e+00> : vector<16xf32>
    %85 = vector.multi_reduction <add>, %82, %cst_25 [1] : vector<16x8xf32> to vector<16xf32>
    %86 = vector.shape_cast %85 : vector<16xf32> to vector<16x1xf32>
    %cst_26 = arith.constant 8.000000e+00 : f32
    %87 = vector.broadcast %cst_26 : f32 to vector<16x1xf32>
    %88 = arith.divf %86, %87 : vector<16x1xf32>
    %89 = arith.mulf %82, %82 : vector<16x8xf32>
    %cst_27 = arith.constant dense<0.000000e+00> : vector<16xf32>
    %90 = vector.multi_reduction <add>, %89, %cst_27 [1] : vector<16x8xf32> to vector<16xf32>
    %91 = vector.shape_cast %90 : vector<16xf32> to vector<16x1xf32>
    %cst_28 = arith.constant 8.000000e+00 : f32
    %92 = vector.broadcast %cst_28 : f32 to vector<16x1xf32>
    %93 = arith.divf %91, %92 : vector<16x1xf32>
    %94 = arith.mulf %88, %88 : vector<16x1xf32>
    %95 = arith.subf %93, %94 : vector<16x1xf32>
    %cst_29 = arith.constant 0.000000e+00 : f32
    %96 = vector.broadcast %cst_29 : f32 to vector<16x1xf32>
    %97 = arith.maximumf %95, %96 : vector<16x1xf32>
    %cst_30 = arith.constant 9.99999974E-6 : f32
    %98 = vector.broadcast %cst_30 : f32 to vector<16x1xf32>
    %99 = arith.addf %97, %98 : vector<16x1xf32>
    %100 = math.rsqrt %99 : vector<16x1xf32>
    %101 = vector.broadcast %88 : vector<16x1xf32> to vector<16x8xf32>
    %102 = arith.subf %82, %101 : vector<16x8xf32>
    %103 = vector.broadcast %100 : vector<16x1xf32> to vector<16x8xf32>
    %104 = arith.mulf %102, %103 : vector<16x8xf32>
    %105 = vector.broadcast %83 : vector<1x8xf32> to vector<16x8xf32>
    %106 = arith.mulf %104, %105 : vector<16x8xf32>
    %107 = vector.broadcast %84 : vector<1x8xf32> to vector<16x8xf32>
    %108 = arith.addf %106, %107 : vector<16x8xf32>
    %cst_31 = arith.constant 0.000000e+00 : f32
    %109 = vector.broadcast %cst_31 : f32 to vector<16x8xf32>
    %110 = arith.maximumf %108, %109 : vector<16x8xf32>
    %111 = vector.extract_strided_slice %15 {offsets = [0, 2], sizes = [16, 1], strides = [1, 1]} : vector<16x3xf32> to vector<16x1xf32>
    %112 = vector.broadcast %111 : vector<16x1xf32> to vector<16x8xf32>
    %113 = arith.mulf %110, %112 : vector<16x8xf32>
    %114 = tpu.concatenate %49, %81, %113 in 1 : vector<16x32xf32>, vector<16x16xf32>, vector<16x8xf32> -> vector<16x56xf32>
    %c0_32 = arith.constant 0 : index
    %c0_33 = arith.constant 0 : index
    %115 = vector.load %arg6[%c0_32, %c0_33] : memref<56x32xf32, #tpu.memory_space<vmem>>, vector<56x32xf32>
    %cst_34 = arith.constant dense<0.000000e+00> : vector<16x32xf32>
    %116 = tpu.matmul %114, %115, %cst_34 {dimension_numbers = #tpu.dot_dimension_numbers<[1], [0], [0], [1], [0, 0, 1, 1], [], []>} : vector<16x56xf32>, vector<56x32xf32>, vector<16x32xf32> -> vector<16x32xf32>
    %c0_35 = arith.constant 0 : index
    %c0_36 = arith.constant 0 : index
    %117 = vector.load %arg7[%c0_35, %c0_36] : memref<1x32xf32, #tpu.memory_space<vmem>>, vector<1x32xf32>
    %118 = vector.broadcast %117 : vector<1x32xf32> to vector<16x32xf32>
    %119 = arith.addf %116, %118 : vector<16x32xf32>
    %c0_37 = arith.constant 0 : index
    %c0_38 = arith.constant 0 : index
    %120 = vector.load %arg8[%c0_37, %c0_38] : memref<1x32xf32, #tpu.memory_space<vmem>>, vector<1x32xf32>
    %c0_39 = arith.constant 0 : index
    %c0_40 = arith.constant 0 : index
    %121 = vector.load %arg9[%c0_39, %c0_40] : memref<1x32xf32, #tpu.memory_space<vmem>>, vector<1x32xf32>
    %cst_41 = arith.constant dense<0.000000e+00> : vector<16xf32>
    %122 = vector.multi_reduction <add>, %119, %cst_41 [1] : vector<16x32xf32> to vector<16xf32>
    %123 = vector.shape_cast %122 : vector<16xf32> to vector<16x1xf32>
    %cst_42 = arith.constant 3.200000e+01 : f32
    %124 = vector.broadcast %cst_42 : f32 to vector<16x1xf32>
    %125 = arith.divf %123, %124 : vector<16x1xf32>
    %126 = arith.mulf %119, %119 : vector<16x32xf32>
    %cst_43 = arith.constant dense<0.000000e+00> : vector<16xf32>
    %127 = vector.multi_reduction <add>, %126, %cst_43 [1] : vector<16x32xf32> to vector<16xf32>
    %128 = vector.shape_cast %127 : vector<16xf32> to vector<16x1xf32>
    %cst_44 = arith.constant 3.200000e+01 : f32
    %129 = vector.broadcast %cst_44 : f32 to vector<16x1xf32>
    %130 = arith.divf %128, %129 : vector<16x1xf32>
    %131 = arith.mulf %125, %125 : vector<16x1xf32>
    %132 = arith.subf %130, %131 : vector<16x1xf32>
    %cst_45 = arith.constant 0.000000e+00 : f32
    %133 = vector.broadcast %cst_45 : f32 to vector<16x1xf32>
    %134 = arith.maximumf %132, %133 : vector<16x1xf32>
    %cst_46 = arith.constant 9.99999974E-6 : f32
    %135 = vector.broadcast %cst_46 : f32 to vector<16x1xf32>
    %136 = arith.addf %134, %135 : vector<16x1xf32>
    %137 = math.rsqrt %136 : vector<16x1xf32>
    %138 = vector.broadcast %125 : vector<16x1xf32> to vector<16x32xf32>
    %139 = arith.subf %119, %138 : vector<16x32xf32>
    %140 = vector.broadcast %137 : vector<16x1xf32> to vector<16x32xf32>
    %141 = arith.mulf %139, %140 : vector<16x32xf32>
    %142 = vector.broadcast %120 : vector<1x32xf32> to vector<16x32xf32>
    %143 = arith.mulf %141, %142 : vector<16x32xf32>
    %144 = vector.broadcast %121 : vector<1x32xf32> to vector<16x32xf32>
    %145 = arith.addf %143, %144 : vector<16x32xf32>
    %cst_47 = arith.constant 0.000000e+00 : f32
    %146 = vector.broadcast %cst_47 : f32 to vector<16x32xf32>
    %147 = arith.maximumf %145, %146 : vector<16x32xf32>
    %c0_48 = arith.constant 0 : index
    %c0_49 = arith.constant 0 : index
    %148 = vector.load %arg10[%c0_48, %c0_49] : memref<16x32xf32, #tpu.memory_space<vmem>>, vector<16x32xf32>
    tpu.vector_store %arg10[%c0_48, %c0_49], %147 {strides = array<i32>} : memref<16x32xf32, #tpu.memory_space<vmem>>, vector<16x32xf32>,
    return
  }
  func.func @transform_0(%arg0: i32) -> (i32, i32) {
    %c0_i32 = arith.constant 0 : i32
    %c0_i32_0 = arith.constant 0 : i32
    return %arg0, %c0_i32 : i32, i32
  }
  func.func @transform_1(%arg0: i32) -> (i32, i32) {
    %c0_i32 = arith.constant 0 : i32
    %c0_i32_0 = arith.constant 0 : i32
    %c0_i32_1 = arith.constant 0 : i32
    return %c0_i32, %c0_i32_0 : i32, i32
  }
  func.func @transform_2(%arg0: i32) -> (i32, i32) {
    %c0_i32 = arith.constant 0 : i32
    %c0_i32_0 = arith.constant 0 : i32
    %c0_i32_1 = arith.constant 0 : i32
    return %c0_i32, %c0_i32_0 : i32, i32
  }
  func.func @transform_3(%arg0: i32) -> (i32, i32) {
    %c0_i32 = arith.constant 0 : i32
    %c0_i32_0 = arith.constant 0 : i32
    %c0_i32_1 = arith.constant 0 : i32
    return %c0_i32, %c0_i32_0 : i32, i32
  }
  func.func @transform_4(%arg0: i32) -> (i32, i32) {
    %c0_i32 = arith.constant 0 : i32
    %c0_i32_0 = arith.constant 0 : i32
    %c0_i32_1 = arith.constant 0 : i32
    return %c0_i32, %c0_i32_0 : i32, i32
  }
  func.func @transform_5(%arg0: i32) -> (i32, i32) {
    %c0_i32 = arith.constant 0 : i32
    %c0_i32_0 = arith.constant 0 : i32
    %c0_i32_1 = arith.constant 0 : i32
    return %c0_i32, %c0_i32_0 : i32, i32
  }
  func.func @transform_6(%arg0: i32) -> (i32, i32) {
    %c0_i32 = arith.constant 0 : i32
    %c0_i32_0 = arith.constant 0 : i32
    %c0_i32_1 = arith.constant 0 : i32
    return %c0_i32, %c0_i32_0 : i32, i32
  }
  func.func @transform_7(%arg0: i32) -> (i32, i32) {
    %c0_i32 = arith.constant 0 : i32
    %c0_i32_0 = arith.constant 0 : i32
    %c0_i32_1 = arith.constant 0 : i32
    return %c0_i32, %c0_i32_0 : i32, i32
  }
  func.func @transform_8(%arg0: i32) -> (i32, i32) {
    %c0_i32 = arith.constant 0 : i32
    %c0_i32_0 = arith.constant 0 : i32
    %c0_i32_1 = arith.constant 0 : i32
    return %c0_i32, %c0_i32_0 : i32, i32
  }
  func.func @transform_9(%arg0: i32) -> (i32, i32) {
    %c0_i32 = arith.constant 0 : i32
    %c0_i32_0 = arith.constant 0 : i32
    return %arg0, %c0_i32 : i32, i32
  }
}

</mosaic_0001>

<bundles_post_ra>
// kernel: tpu_custom_call.1
= control target key start
LH: loop header
LB: loop body
LE: loop exit
PB: predicated region body
PF: predicated region fallthrough
CT: control target
= control target key end

     0   :  { %s929_s0 = inlined_call_operand.vmem [shape: f32[16,32], index: 0, kind: input, shape index: {}]   ;;  %s930_s1 = inlined_call_operand.vmem [shape: f32[32,59], index: 1, kind: input, shape index: {}]   ;;  %s931_s2 = inlined_call_operand.vmem [shape: f32[1,59], index: 2, kind: input, shape index: {}]   ;;  %s932_s3 = inlined_call_operand.vmem [shape: f32[1,56], index: 3, kind: input, shape index: {}]   ;;  %s933_s4 = inlined_call_operand.vmem [shape: f32[1,56], index: 4, kind: input, shape index: {}]   ;;  %s934_s5 = inlined_call_operand.vmem [shape: f32[56,32], index: 5, kind: input, shape index: {}]   ;;  %s935_s6 = inlined_call_operand.vmem [shape: f32[1,32], index: 6, kind: input, shape index: {}]   ;;  %s936_s7 = inlined_call_operand.vmem [shape: f32[1,32], index: 7, kind: input, shape index: {}]   ;;  %s937_s8 = inlined_call_operand.vmem [shape: f32[1,32], index: 8, kind: input, shape index: {}]   ;;  %s938_s9 = inlined_call_operand.hbm [shape: f32[16,32], index: 9, kind: output, shape index: {}]  }
   0x1   :  { %v38_v0 = vld [vmem:[%s930_s1 + $0x18] sm:$0xff]  ;;  %v37_v1 = vld [vmem:[%s930_s1 + $0x10] sm:$0xff]  ;;  %v36_v2 = vld [vmem:[%s930_s1 + $0x8] sm:$0xff] }
   0x2   :  { %62 = vmatpush.msra.mxu0 %v38_v0  ;;  %520 = vmatpush.msra.mxu3 %v38_v0  ;;  %v35_v3 = vld [vmem:[%s930_s1] sm:$0xff] }
   0x4   :  { %63 = vmatpush.msra.mxu0 %v37_v1  ;;  %521 = vmatpush.msra.mxu3 %v37_v1 }
   0x5   :  { %14 = vsyncpa [#allocation3], 0  ;;  %v33_v4 = vld [vmem:[%s929_s0] sm:$0xff]  ;;  %vm43_vm0 = vcmask 261120   ;;  %v34_v5 = vld [vmem:[%s929_s0 + $0x8] sm:$0xff]  ;;  %s609_s22 = smov 80  }
   0x6   :  { %64 = vmatpush.msra.mxu0 %v36_v2  ;;  %522 = vmatpush.msra.mxu3 %v36_v2  ;;  %v547_v6 = vld [vmem:[%s931_s2] ss:$0 sm:$0xff]  ;;  %vm73_vm1 = vcmask 482752   ;;  %s610_s0 = smov 96   ;;  %vm222_vm2 = vcmask 130048   ;;  %vm308_vm3 = vcmask 64512  }
   0x7   :  { %s611_s2 = smov 72   ;;  %vm94_vm4 = vcmask 23552   ;;  %v612_v50 = vmov 58   ;;  %v613_v51 = vmov 57   ;;  %v614_v52 = vmov 56   ;;  %s620_s23 = smov 8  }
   0x8   :  { %65 = vmatpush.msra.mxu0 %v35_v3  ;;  %523 = vmatpush.msra.mxu3 %v35_v3 }
   0x9   :  { %516 = vmatmul.msk.f32.vlgmr.msra.gmra.mxu0 %vm43_vm0, %v33_v4  ;;  %517 = vmatmul.msk.f32.vlgmr.msra.gmra.mxu3 %vm43_vm0, %v34_v5 }
   0xa   :  { %545 = vset.pattern.permute.xlu0 %v612_v50  ;;  %544 = vset.pattern.permute.xlu1 %v613_v51 }
   0xb   :  { %543 = vset.pattern.permute.xlu2 %v614_v52 }
  0x86   :  { %v67_v7 = vpop.f32.mrf.mxu0 }
  0x87   :  { %v694_v8 = vadd.f32 %v547_v6, %v67_v7 }
  0x89   :  { %302 = vrot.lane.b32.xlu1 %v694_v8, %s609_s22  ;;  %v74_v13 = vsel %vm73_vm1, %v694_v8, -inf  ;;  %v148_v14 = vmul.f32 %v694_v8, %v694_v8  ;;  %v133_v44 = vsel %vm43_vm0, %v694_v8, 0.0 }
  0x8b   :  { %v150_v46 = vsel %vm43_vm0, %v148_v14, 0.0 }
  0x8c   :  { %v70_v9 = vpop.f32.mrf.mxu3 }
  0x8d   :  { %v698_v10 = vadd.f32 %v547_v6, %v70_v9 }
  0x8f   :  { %218 = vrot.lane.b32.xlu2 %v698_v10, %s610_s0  ;;  %v77_v11 = vsel %vm73_vm1, %v698_v10, -inf  ;;  %v149_v12 = vmul.f32 %v698_v10, %v698_v10  ;;  %v136_v31 = vsel %vm43_vm0, %v698_v10, 0.0 }
  0x90   :  { %78 = vmax.xlane.f32.xlu0 %v77_v11 }
  0x91   :  { %326 = vrot.lane.b32.xlu1 %v149_v12, %s609_s22  ;;  %v153_v18 = vsel %vm43_vm0, %v149_v12, 0.0 }
  0x97   :  { %304 = vrot.lane.b32.xlu2 %v698_v10, %s609_s22 }
  0x98   :  { %75 = vmax.xlane.f32.xlu0 %v74_v13 }
  0x9f   :  { %216 = vrot.lane.b32.xlu2 %v694_v8, %s610_s0 }
  0xa7   :  { %240 = vrot.lane.b32.xlu2 %v148_v14, %s610_s0 }
  0xac   :  { %242 = vrot.lane.b32.xlu0 %v149_v12, %s610_s0 }
  0xe9   :  { %v219_v15 = vpop.permute.xlu2 %218 }
  0xea   :  { %v226_v16 = vsel %vm222_vm2, %v219_v15, 0.0 }
  0xeb   :  { %227 = vadd.xlane.f32.xlu2 %v226_v16  ;;  %v615_v16 = vmov 8.0  }
  0xf1   :  { %v305_v17 = vpop.permute.xlu2 %304 }
  0xf2   :  { %v312_v19 = vsel %vm308_vm3, %v305_v17, 0.0  ;;  %v616_v17 = vmov 32.0  }
  0xf3   :  { %154 = vadd.xlane.f32.xlu2 %v153_v18  ;;  %313 = vadd.xlane.f32.xlu0 %v312_v19  ;;  %v617_v18 = vmov 16.0  }
  0xf9   :  { %v217_v34 = vpop.permute.xlu2 %216 }
  0xfa   :  { %v223_v35 = vsel %vm222_vm2, %v217_v34, 0.0 }
  0xfb   :  { %v303_v20 = vpop.permute.xlu1 %302 }
  0xfc   :  { %v309_v41 = vsel %vm308_vm3, %v303_v20, 0.0 }
 0x101   :  { %v241_v36 = vpop.permute.xlu2 %240 }
 0x102   :  { %v246_v37 = vsel %vm222_vm2, %v241_v36, 0.0 }
 0x103   :  { %v79_v21 = vpop.xlane.xlu0 %78  ;;  %v327_v22 = vpop.permute.xlu1 %326 }
 0x104   :  { %v333_v23 = vsel %vm308_vm3, %v327_v22, 0.0  ;;  %v81_v27 = vsub.f32 %v698_v10, %v79_v21 }
 0x105   :  { %334 = vadd.xlane.f32.xlu0 %v333_v23 }
 0x106   :  { %v84_v28 = vmul.f32 1.442695, %v81_v27 }
 0x10b   :  { %v76_v24 = vpop.xlane.xlu0 %75 }
 0x10c   :  { %v80_v25 = vsub.f32 %v694_v8, %v76_v24 }
 0x10e   :  { %v82_v26 = vmul.f32 1.442695, %v80_v25 }
 0x110   :  { %553 = vpow2.f32 %v82_v26 }
 0x111   :  { %555 = vpow2.f32 %v84_v28 }
 0x116   :  { %v717_v29 = vpop.eup %553 }
 0x117   :  { %88 = vrot.lane.b32.xlu1 %v717_v29, %s611_s2  ;;  %v720_v30 = vpop.eup %555 }
 0x11e   :  { %v243_v32 = vpop.permute.xlu0 %242 }
 0x11f   :  { %90 = vrot.lane.b32.xlu1 %v720_v30, %s611_s2  ;;  %v249_v33 = vsel %vm222_vm2, %v243_v32, 0.0  ;;  %s619_s2 = smov 128  }
 0x127   :  { %324 = vrot.lane.b32.xlu1 %v148_v14, %s609_s22 }
 0x151   :  { %137 = vadd.xlane.f32.xlu1 %v136_v31 }
 0x159   :  { %250 = vadd.xlane.f32.xlu1 %v249_v33 }
 0x15e   :  { %v736_v48 = vpop.xlane.xlu2 %227 }
 0x161   :  { %224 = vadd.xlane.f32.xlu1 %v223_v35 }
 0x166   :  { %v734_v47 = vpop.xlane.xlu0 %313  ;;  %v740_v53 = vpop.xlane.xlu2 %154 }
 0x169   :  { %247 = vadd.xlane.f32.xlu1 %v246_v37 }
 0x178   :  { %v738_v49 = vpop.xlane.xlu0 %334 }
 0x189   :  { %v89_v38 = vpop.permute.xlu1 %88 }
 0x18a   :  { %v95_v39 = vsel %vm94_vm4, %v89_v38, 0.0 }
 0x18b   :  { %96 = vadd.xlane.f32.xlu0 %v95_v39 }
 0x191   :  { %v91_v40 = vpop.permute.xlu1 %90 }
 0x192   :  { %v98_v42 = vsel %vm94_vm4, %v91_v40, 0.0 }
 0x193   :  { %310 = vadd.xlane.f32.xlu0 %v309_v41  ;;  %99 = vadd.xlane.f32.xlu2 %v98_v42 }
 0x199   :  { %v325_v43 = vpop.permute.xlu1 %324 }
 0x19a   :  { %v330_v45 = vsel %vm308_vm3, %v325_v43, 0.0 }
 0x19b   :  { %134 = vadd.xlane.f32.xlu2 %v133_v44  ;;  %331 = vadd.xlane.f32.xlu0 %v330_v45 }
 0x1a3   :  { %151 = vadd.xlane.f32.xlu2 %v150_v46 }
 0x1c4   :  { %v138_v20 = vpop.xlane.xlu1 %137 }
 0x1fe   :  { %v97_v54 = vpop.xlane.xlu0 %96 }
 0x1ff   :  { %557 = vrcp.f32 %v97_v54  ;;  %v112_v6 = vand.u32 2147483648, %v97_v54  ;;  %vm106_vm10 = vweird.f32 %v97_v54  ;;  %v110_v11 = vand.u32 2147483647, %v97_v54 }
 0x201   :  { %v113_v13 = vor.u32 1.1754944e-38, %v112_v6  ;;  %vm111_vm12 = vcmp.eq.f32.partialorder %v110_v11, 8.507059e+37 }
 0x205   :  { %v558_v56 = vpop.eup %557 }
 0x206   :  { %v100_v55 = vpop.xlane.xlu2 %99  ;;  %v102_v57 = vmul.f32 %v558_v56, %v97_v54  ;;  %vm107_vm9 = vweird.f32 %v558_v56  ;;  %v311_v43 = vpop.xlane.xlu0 %310 }
 0x207   :  { %559 = vrcp.f32 %v100_v55  ;;  %v127_v62 = vand.u32 2147483648, %v100_v55  ;;  %v125_v1 = vand.u32 2147483647, %v100_v55  ;;  %vm121_vm6 = vweird.f32 %v100_v55  ;;  %vm108_vm11 = vmor %vm106_vm10, %vm107_vm9 }
 0x208   :  { %v103_v59 = vsub.f32 1.0, %v102_v57  ;;  %561 = vrcp.f32 %v615_v16 }
 0x209   :  { %v128_v3 = vor.u32 1.1754944e-38, %v127_v62  ;;  %vm126_vm8 = vcmp.eq.f32.partialorder %v125_v1, 8.507059e+37  ;;  %563 = vrcp.f32 %v616_v17 }
 0x20a   :  { %v104_v63 = vmul.f32 %v558_v56, %v103_v59  ;;  %565 = vrcp.f32 %v617_v18 }
 0x20c   :  { %v105_v5 = vadd.f32 %v558_v56, %v104_v63 }
 0x20d   :  { %v560_v58 = vpop.eup %559 }
 0x20e   :  { %v117_v60 = vmul.f32 %v560_v58, %v100_v55  ;;  %vm122_vm5 = vweird.f32 %v560_v58  ;;  %v109_v12 = vsel %vm108_vm11, %v558_v56, %v105_v5  ;;  %v562_v19 = vpop.eup %561  ;;  %v135_v41 = vpop.xlane.xlu2 %134 }
 0x20f   :  { %vm123_vm7 = vmor %vm121_vm6, %vm122_vm5  ;;  %v114_v14 = vsel %vm111_vm12, %v113_v13, %v109_v12  ;;  %v564_v21 = vpop.eup %563  ;;  %v316_v23 = vmul.f32 8.0, %v562_v19  ;;  %vm320_vm13 = vweird.f32 %v562_v19  ;;  %v397_v13 = vld [vmem:[%s934_s5 + $0x30] sm:$0xff] }
 0x210   :  { %v118_v61 = vsub.f32 1.0, %v117_v60  ;;  %v115_v15 = vmul.f32 %v717_v29, %v114_v14  ;;  %v566_v22 = vpop.eup %565  ;;  %v140_v24 = vmul.f32 32.0, %v564_v21  ;;  %v251_v29 = vpop.xlane.xlu1 %250  ;;  %vm144_vm14 = vweird.f32 %v564_v21  ;;  %524 = vmatpush.msra.mxu2 %v397_v13  ;;  %418 = vmatpush.msra.mxu1 %v397_v13 }
 0x211   :  { %v230_v25 = vmul.f32 16.0, %v566_v22  ;;  %v317_v26 = vsub.f32 1.0, %v316_v23  ;;  %vm234_vm15 = vweird.f32 %v566_v22  ;;  %v332_v60 = vpop.xlane.xlu0 %331  ;;  %v396_v23 = vld [vmem:[%s934_s5 + $0x28] sm:$0xff] }
 0x212   :  { %v119_v0 = vmul.f32 %v560_v58, %v118_v61  ;;  %v141_v27 = vsub.f32 1.0, %v140_v24  ;;  %v395_v24 = vld [vmem:[%s934_s5 + $0x20] sm:$0xff]  ;;  %525 = vmatpush.msra.mxu2 %v396_v23  ;;  %419 = vmatpush.msra.mxu1 %v396_v23 }
 0x213   :  { %v231_v28 = vsub.f32 1.0, %v230_v25 }
 0x214   :  { %v120_v2 = vadd.f32 %v560_v58, %v119_v0  ;;  %v142_v31 = vmul.f32 %v564_v21, %v141_v27  ;;  %526 = vmatpush.msra.mxu2 %v395_v24  ;;  %420 = vmatpush.msra.mxu1 %v395_v24 }
 0x215   :  { %v232_v32 = vmul.f32 %v566_v22, %v231_v28 }
 0x216   :  { %v124_v4 = vsel %vm123_vm7, %v560_v58, %v120_v2  ;;  %v143_v34 = vadd.f32 %v564_v21, %v142_v31 }
 0x217   :  { %v129_v7 = vsel %vm126_vm8, %v128_v3, %v124_v4  ;;  %v233_v35 = vadd.f32 %v566_v22, %v232_v32 }
 0x218   :  { %v130_v9 = vmul.f32 %v720_v30, %v129_v7  ;;  %v318_v30 = vmul.f32 %v562_v19, %v317_v26  ;;  %v744_v37 = vsel %vm144_vm14, %v564_v21, %v143_v34  ;;  %v225_v38 = vpop.xlane.xlu1 %224  ;;  %v394_v26 = vld [vmem:[%s934_s5 + $0x18] sm:$0xff] }
 0x219   :  { %v235_v39 = vsel %vm234_vm15, %v566_v22, %v233_v35  ;;  %v747_v40 = vmul.f32 %v744_v37, %v138_v20  ;;  %v157_v52 = vmul.f32 %v740_v53, %v744_v37  ;;  %v767_v59 = vmul.f32 %v744_v37, %v135_v41  ;;  %527 = vmatpush.msra.mxu2 %v394_v26  ;;  %v392_v35 = vld [vmem:[%s934_s5 + $0x8] sm:$0xff] }
 0x21a   :  { %209 = vperm.xlu2 %543, %v130_v9   ;;  %381 = vperm.xlu0 %545, %v130_v9   ;;  %v319_v33 = vadd.f32 %v562_v19, %v318_v30  ;;  %v753_v44 = vmul.f32 %v235_v39, %v736_v48  ;;  %v253_v51 = vmul.f32 %v251_v29, %v235_v39  ;;  %v393_v29 = vld [vmem:[%s934_s5 + $0x10] sm:$0xff] }
 0x21b   :  { %297 = vperm.xlu1 %544, %v130_v9   ;;  %v159_v46 = vmul.f32 %v747_v40, %v747_v40  ;;  %v764_v57 = vmul.f32 %v235_v39, %v225_v38  ;;  %v158_v4 = vmul.f32 %v767_v59, %v767_v59  ;;  %421 = vmatpush.msra.mxu1 %v394_v26 }
 0x21c   :  { %v321_v36 = vsel %vm320_vm13, %v562_v19, %v319_v33  ;;  %528 = vmatpush.msra.mxu2 %v393_v29  ;;  %v186_v24 = vsub.f32 %v694_v8, %v767_v59 }
 0x21d   :  { %v750_v42 = vmul.f32 %v321_v36, %v734_v47  ;;  %v337_v45 = vmul.f32 %v738_v49, %v321_v36  ;;  %v255_v47 = vmul.f32 %v753_v44, %v753_v44  ;;  %v161_v55 = vsub.f32 %v157_v52, %v159_v46  ;;  %v152_v49 = vpop.xlane.xlu2 %151  ;;  %422 = vmatpush.msra.mxu1 %v393_v29 }
 0x21e   :  { %v769_v63 = vmul.f32 %v321_v36, %v311_v43  ;;  %v156_v0 = vmul.f32 %v152_v49, %v744_v37  ;;  %v254_v1 = vmul.f32 %v764_v57, %v764_v57  ;;  %v336_v2 = vmul.f32 %v332_v60, %v321_v36  ;;  %v391_v36 = vld [vmem:[%s934_s5] sm:$0xff]  ;;  %529 = vmatpush.msra.mxu2 %v392_v35 }
 0x21f   :  { %v257_v56 = vsub.f32 %v253_v51, %v255_v47  ;;  %v163_v61 = vmax.f32 %v161_v55, 0.0  ;;  %423 = vmatpush.msra.mxu1 %v392_v35 }
 0x220   :  { %v248_v48 = vpop.xlane.xlu1 %247  ;;  %v338_v7 = vmul.f32 %v769_v63, %v769_v63  ;;  %v160_v11 = vsub.f32 %v156_v0, %v158_v4  ;;  %530 = vmatpush.msra.mxu2 %v391_v36  ;;  %v367_v0 = vsub.f32 %v698_v10, %v750_v42 }
 0x221   :  { %v252_v62 = vmul.f32 %v248_v48, %v235_v39  ;;  %v259_v53 = vmax.f32 %v257_v56, 0.0  ;;  %v778_v5 = vadd.f32 1e-05, %v163_v61  ;;  %424 = vmatpush.msra.mxu1 %v391_v36 }
 0x222   :  { %204 = vperm.xlu2 %543, %v115_v15   ;;  %v340_v12 = vsub.f32 %v336_v2, %v338_v7  ;;  %v187_v7 = vsub.f32 %v698_v10, %v747_v40 }
 0x223   :  { %293 = vperm.xlu1 %544, %v115_v15   ;;  %v256_v6 = vsub.f32 %v252_v62, %v254_v1  ;;  %v782_v9 = vadd.f32 1e-05, %v259_v53  ;;  %vm182_vm6 = vweird.f32 %v778_v5  ;;  %v550_v62 = vld [vmem:[%s935_s6] ss:$0 sm:$0xff] }
 0x224   :  { %v342_v16 = vmax.f32 %v340_v12, 0.0 }
 0x225   :  { %v258_v14 = vmax.f32 %v256_v6, 0.0  ;;  %vm278_vm8 = vweird.f32 %v782_v9 }
 0x226   :  { %v798_v21 = vadd.f32 1e-05, %v342_v16  ;;  %v549_v16 = vld [vmem:[%s933_s4] ss:$0 sm:$0xff] }
 0x227   :  { %v790_v17 = vadd.f32 1e-05, %v258_v14 }
 0x229   :  { %vm268_vm12 = vweird.f32 %v790_v17 }
 0x22a   :  { %546 = vset.pattern.permute.xlu2 %v612_v50  ;;  %v339_v50 = vmul.f32 %v750_v42, %v750_v42  ;;  %v548_v42 = vld [vmem:[%s932_s3] ss:$0 sm:$0xff] }
 0x22b   :  { %377 = vperm.xlu2 %546, %v115_v15   ;;  %v162_v15 = vmax.f32 %v160_v11, 0.0 }
 0x22c   :  { %v341_v54 = vsub.f32 %v337_v45, %v339_v50 }
 0x22d   :  { %v794_v19 = vadd.f32 1e-05, %v162_v15 }
 0x22e   :  { %v343_v58 = vmax.f32 %v341_v54, 0.0 }
 0x22f   :  { %vm172_vm15 = vweird.f32 %v794_v19 }
 0x230   :  { %v774_v3 = vadd.f32 1e-05, %v343_v58 }
 0x232   :  { %567 = vrsqrt.f32 %v774_v3  ;;  %vm362_vm2 = vweird.f32 %v774_v3 }
 0x233   :  { %569 = vrsqrt.f32 %v778_v5 }
 0x234   :  { %571 = vrsqrt.f32 %v782_v9 }
 0x235   :  { %573 = vrsqrt.f32 %v790_v17 }
 0x236   :  { %575 = vrsqrt.f32 %v794_v19 }
 0x237   :  { %577 = vrsqrt.f32 %v798_v21 }
 0x238   :  { %v792_v18 = vpop.eup %567 }
 0x239   :  { %v796_v20 = vpop.eup %569  ;;  %v357_v25 = vmul.f32 %v792_v18, %v774_v3  ;;  %vm363_vm1 = vweird.f32 %v792_v18 }
 0x23a   :  { %v800_v22 = vpop.eup %571  ;;  %v177_v27 = vmul.f32 %v796_v20, %v778_v5  ;;  %vm183_vm3 = vweird.f32 %v796_v20  ;;  %vm854_vm5 = vmor %vm362_vm2, %vm363_vm1  ;;  %v283_v5 = vsub.f32 %v698_v10, %v753_v44  ;;  %vm352_vm1 = vweird.f32 %v798_v21 }
 0x23b   :  { %v273_v28 = vmul.f32 %v800_v22, %v782_v9  ;;  %v358_v30 = vmul.f32 %v792_v18, %v357_v25  ;;  %v824_v31 = vpop.eup %573  ;;  %vm279_vm4 = vweird.f32 %v800_v22  ;;  %vm184_vm7 = vmor %vm182_vm6, %vm183_vm3 }
 0x23c   :  { %v178_v32 = vmul.f32 %v796_v20, %v177_v27  ;;  %v828_v34 = vpop.eup %575  ;;  %v263_v45 = vmul.f32 %v824_v31, %v790_v17  ;;  %vm280_vm9 = vmor %vm278_vm8, %vm279_vm4  ;;  %vm269_vm10 = vweird.f32 %v824_v31  ;;  %vm388_vm4 = vcmask 392192  }
 0x23d   :  { %v274_v33 = vmul.f32 %v800_v22, %v273_v28  ;;  %v836_v38 = vpop.eup %577  ;;  %v359_v39 = vmul.f32 0.5, %v358_v30  ;;  %v167_v46 = vmul.f32 %v828_v34, %v794_v19  ;;  %vm173_vm11 = vweird.f32 %v828_v34  ;;  %vm881_vm14 = vmor %vm268_vm12, %vm269_vm10 }
 0x23e   :  { %v179_v41 = vmul.f32 0.5, %v178_v32  ;;  %v347_v50 = vmul.f32 %v836_v38, %v798_v21  ;;  %v264_v54 = vmul.f32 %v824_v31, %v263_v45  ;;  %vm353_vm13 = vweird.f32 %v836_v38  ;;  %vm174_vm2 = vmor %vm172_vm15, %vm173_vm11 }
 0x23f   :  { %v275_v43 = vmul.f32 0.5, %v274_v33  ;;  %v360_v51 = vsub.f32 1.5, %v359_v39  ;;  %v168_v55 = vmul.f32 %v828_v34, %v167_v46  ;;  %vm354_vm3 = vmor %vm352_vm1, %vm353_vm13  ;;  %v282_v19 = vsub.f32 %v694_v8, %v764_v57 }
 0x240   :  { %v180_v52 = vsub.f32 1.5, %v179_v41  ;;  %v348_v56 = vmul.f32 %v836_v38, %v347_v50  ;;  %v265_v58 = vmul.f32 0.5, %v264_v54  ;;  %v366_v21 = vsub.f32 %v694_v8, %v769_v63 }
 0x241   :  { %v276_v47 = vsub.f32 1.5, %v275_v43  ;;  %v361_v48 = vmul.f32 %v792_v18, %v360_v51  ;;  %v169_v60 = vmul.f32 0.5, %v168_v55 }
 0x242   :  { %v181_v49 = vmul.f32 %v796_v20, %v180_v52  ;;  %v349_v53 = vmul.f32 0.5, %v348_v56  ;;  %v266_v3 = vsub.f32 1.5, %v265_v58 }
 0x243   :  { %v277_v61 = vmul.f32 %v800_v22, %v276_v47  ;;  %v365_v1 = vsel %vm854_vm5, %v792_v18, %v361_v48  ;;  %v170_v4 = vsub.f32 1.5, %v169_v60  ;;  %vm402_vm5 = vcmask 457728  }
 0x244   :  { %v185_v2 = vsel %vm184_vm7, %v796_v20, %v181_v49  ;;  %v350_v9 = vsub.f32 1.5, %v349_v53  ;;  %v369_v11 = vmul.f32 %v367_v0, %v365_v1  ;;  %v267_v44 = vmul.f32 %v824_v31, %v266_v3 }
 0x245   :  { %v281_v6 = vsel %vm280_vm9, %v800_v22, %v277_v61  ;;  %v189_v12 = vmul.f32 %v187_v7, %v185_v2  ;;  %v171_v15 = vmul.f32 %v828_v34, %v170_v4 }
 0x246   :  { %v285_v14 = vmul.f32 %v283_v5, %v281_v6  ;;  %v351_v10 = vmul.f32 %v836_v38, %v350_v9  ;;  %v371_v18 = vmul.f32 %v548_v42, %v369_v11  ;;  %v271_v23 = vsel %vm881_vm14, %v824_v31, %v267_v44 }
 0x247   :  { %v194_v20 = vmul.f32 %v548_v42, %v189_v12  ;;  %v175_v22 = vsel %vm174_vm2, %v828_v34, %v171_v15  ;;  %v284_v30 = vmul.f32 %v282_v19, %v271_v23 }
 0x248   :  { %v287_v17 = vmul.f32 %v548_v42, %v285_v14  ;;  %v355_v25 = vsel %vm354_vm3, %v836_v38, %v351_v10  ;;  %v373_v26 = vadd.f32 %v549_v16, %v371_v18  ;;  %v188_v28 = vmul.f32 %v186_v24, %v175_v22 }
 0x249   :  { %v199_v27 = vadd.f32 %v549_v16, %v194_v20  ;;  %v368_v32 = vmul.f32 %v366_v21, %v355_v25  ;;  %v286_v39 = vmul.f32 %v548_v42, %v284_v30 }
 0x24a   :  { %v289_v29 = vadd.f32 %v549_v16, %v287_v17  ;;  %v375_v34 = vmax.f32 %v373_v26, 0.0  ;;  %v193_v35 = vmul.f32 %v548_v42, %v188_v28 }
 0x24b   :  { %v201_v31 = vmax.f32 %v199_v27, 0.0  ;;  %v370_v41 = vmul.f32 %v548_v42, %v368_v32  ;;  %v288_v46 = vadd.f32 %v549_v16, %v286_v39 }
 0x24c   :  { %v291_v36 = vmax.f32 %v289_v29, 0.0  ;;  %v198_v8 = vadd.f32 %v549_v16, %v193_v35 }
 0x24d   :  { %v372_v50 = vadd.f32 %v549_v16, %v370_v41  ;;  %v290_v54 = vmax.f32 %v288_v46, 0.0 }
 0x24e   :  { %v200_v52 = vmax.f32 %v198_v8, 0.0 }
 0x24f   :  { %v374_v55 = vmax.f32 %v372_v50, 0.0 }
 0x274   :  { %v210_v13 = vpop.permute.xlu2 %209 }
 0x275   :  { %v213_v38 = vmul.f32 %v210_v13, %v201_v31 }
 0x27c   :  { %v205_v33 = vpop.permute.xlu2 %204 }
 0x27d   :  { %v212_v48 = vmul.f32 %v205_v33, %v200_v52 }
 0x285   :  { %v378_v47 = vpop.permute.xlu2 %377 }
 0x286   :  { %v384_v58 = vmul.f32 %v378_v47, %v374_v55 }
 0x28c   :  { %v382_v57 = vpop.permute.xlu0 %381 }
 0x28d   :  { %v298_v59 = vpop.permute.xlu1 %297  ;;  %v385_v43 = vmul.f32 %v382_v57, %v375_v34 }
 0x28e   :  { %v301_v45 = vmul.f32 %v298_v59, %v291_v36  ;;  %v552_v36 = vld [vmem:[%s937_s8] ss:$0 sm:$0xff]  ;;  %s504_s8 = sshll.u32 %s938_s9, 4  ;;  %s505_s8 = int_to_ptr.hbm [resolvable:$true] %s504_s8 }
 0x290   :  { %v387_v63 = vsel %vm43_vm0, %v213_v38, %v301_v45 }
 0x291   :  { %v390_v51 = vsel %vm388_vm4, %v387_v63, %v385_v43 }
 0x292   :  { %519 = vmatmul.msk.f32.vlgmr.msra.gmra.mxu2 %vm402_vm5, %v390_v51 }
 0x295   :  { %v294_v56 = vpop.permute.xlu1 %293 }
 0x296   :  { %v300_v49 = vmul.f32 %v294_v56, %v290_v54 }
 0x298   :  { %v386_v60 = vsel %vm43_vm0, %v212_v48, %v300_v49 }
 0x299   :  { %v389_v61 = vsel %vm388_vm4, %v386_v60, %v384_v58 }
 0x29a   :  { %518 = vmatmul.msk.f32.vlgmr.msra.gmra.mxu1 %vm402_vm5, %v389_v61 }
 0x315   :  { %v429_v53 = vpop.f32.mrf.mxu2 }
 0x316   :  { %v430_v0 = vadd.f32 %v550_v62, %v429_v53 }
 0x317   :  { %v426_v1 = vpop.f32.mrf.mxu1 }
 0x318   :  { %v427_v2 = vadd.f32 %v550_v62, %v426_v1  ;;  %v437_v3 = vsel %vm43_vm0, %v430_v0, 0.0  ;;  %v443_v7 = vmul.f32 %v430_v0, %v430_v0 }
 0x319   :  { %438 = vadd.xlane.f32.xlu2 %v437_v3 }
 0x31a   :  { %v434_v4 = vsel %vm43_vm0, %v427_v2, 0.0  ;;  %v442_v6 = vmul.f32 %v427_v2, %v427_v2  ;;  %v447_v9 = vsel %vm43_vm0, %v443_v7, 0.0 }
 0x31b   :  { %435 = vadd.xlane.f32.xlu1 %v434_v4 }
 0x31c   :  { %v444_v5 = vsel %vm43_vm0, %v442_v6, 0.0 }
 0x31d   :  { %445 = vadd.xlane.f32.xlu0 %v444_v5 }
 0x323   :  { %448 = vadd.xlane.f32.xlu1 %v447_v9 }
 0x38c   :  { %v439_v12 = vpop.xlane.xlu2 %438 }
 0x38d   :  { %v441_v44 = vmul.f32 %v439_v12, %v744_v37 }
 0x38e   :  { %v436_v42 = vpop.xlane.xlu1 %435 }
 0x38f   :  { %v440_v11 = vmul.f32 %v436_v42, %v744_v37  ;;  %v453_v18 = vmul.f32 %v441_v44, %v441_v44  ;;  %v481_v59 = vsub.f32 %v430_v0, %v441_v44 }
 0x390   :  { %v446_v13 = vpop.xlane.xlu0 %445 }
 0x391   :  { %v452_v14 = vmul.f32 %v440_v11, %v440_v11  ;;  %v450_v15 = vmul.f32 %v446_v13, %v744_v37  ;;  %v480_v33 = vsub.f32 %v427_v2, %v440_v11 }
 0x393   :  { %v454_v10 = vsub.f32 %v450_v15, %v452_v14 }
 0x395   :  { %v456_v40 = vmax.f32 %v454_v10, 0.0 }
 0x396   :  { %v449_v16 = vpop.xlane.xlu1 %448 }
 0x397   :  { %v458_v20 = vadd.f32 1e-05, %v456_v40  ;;  %v451_v17 = vmul.f32 %v449_v16, %v744_v37  ;;  %v551_v37 = vld [vmem:[%s936_s7] ss:$0 sm:$0xff]  ;;  %s618_s7 = smov [#allocation2]  }
 0x398   :  { %s502_s1 = sshll.u32 %s618_s7, 4  ;;  %s503_s1 = int_to_ptr.vmem [resolvable:$true] %s502_s1 }
 0x399   :  { %579 = vrsqrt.f32 %v458_v20  ;;  %v455_v22 = vsub.f32 %v451_v17, %v453_v18  ;;  %vm466_vm7 = vweird.f32 %v458_v20 }
 0x39b   :  { %v457_v23 = vmax.f32 %v455_v22, 0.0 }
 0x39d   :  { %v459_v19 = vadd.f32 1e-05, %v457_v23 }
 0x39f   :  { %v580_v24 = vpop.eup %579  ;;  %581 = vrsqrt.f32 %v459_v19  ;;  %vm476_vm10 = vweird.f32 %v459_v19 }
 0x3a0   :  { %v461_v25 = vmul.f32 %v580_v24, %v458_v20  ;;  %vm467_vm6 = vweird.f32 %v580_v24 }
 0x3a1   :  { %vm468_vm8 = vmor %vm466_vm7, %vm467_vm6 }
 0x3a2   :  { %v462_v21 = vmul.f32 %v580_v24, %v461_v25 }
 0x3a4   :  { %v463_v26 = vmul.f32 0.5, %v462_v21 }
 0x3a5   :  { %v582_v27 = vpop.eup %581 }
 0x3a6   :  { %v464_v28 = vsub.f32 1.5, %v463_v26  ;;  %v471_v29 = vmul.f32 %v582_v27, %v459_v19  ;;  %vm477_vm9 = vweird.f32 %v582_v27 }
 0x3a7   :  { %vm478_vm11 = vmor %vm476_vm10, %vm477_vm9 }
 0x3a8   :  { %v465_v30 = vmul.f32 %v580_v24, %v464_v28  ;;  %v472_v32 = vmul.f32 %v582_v27, %v471_v29 }
 0x3aa   :  { %v469_v34 = vsel %vm468_vm8, %v580_v24, %v465_v30  ;;  %v473_v31 = vmul.f32 0.5, %v472_v32 }
 0x3ab   :  { %v482_v35 = vmul.f32 %v480_v33, %v469_v34 }
 0x3ac   :  { %v474_v57 = vsub.f32 1.5, %v473_v31 }
 0x3ad   :  { %v487_v39 = vmul.f32 %v551_v37, %v482_v35 }
 0x3ae   :  { %v475_v41 = vmul.f32 %v582_v27, %v474_v57 }
 0x3af   :  { %v492_v43 = vadd.f32 %v552_v36, %v487_v39 }
 0x3b0   :  { %v479_v38 = vsel %vm478_vm11, %v582_v27, %v475_v41 }
 0x3b1   :  { %v483_v45 = vmul.f32 %v481_v59, %v479_v38  ;;  %v494_v8 = vmax.f32 %v492_v43, 0.0 }
 0x3b3   :  { %v488_v63 = vmul.f32 %v551_v37, %v483_v45  ;;  %496 = vst.msk [vmem:[#allocation2] sm:$0xff] %vm43_vm0, %v494_v8 }
 0x3b5   :  { %v493_v46 = vadd.f32 %v552_v36, %v488_v63 }
 0x3b7   :  { %v495_v50 = vmax.f32 %v493_v46, 0.0 }
 0x3b9   :  { %497 = vst.msk [vmem:[#allocation2 + $0x8] sm:$0xff] %vm43_vm0, %v495_v50 }
 0x3ba   :  { %510 = dma.vmem_to_hbm [thread:$0]  %s503_s1, 256, %s505_s8, [#allocation3], %s619_s2, %s619_s2, %s620_s23  }
 0x3bb   :  { %607 = dma.done.wait [#allocation3], 256  }
 0x3bc   :  { %608 = vsyncadd [#allocation3], 4294967040 }
 0x3bd   :  { %515 = vsyncpa [#allocation3], 1 }

// kernel: tpu_custom_call.1
= control target key start
LH: loop header
LB: loop body
LE: loop exit
PB: predicated region body
PF: predicated region fallthrough
CT: control target
= control target key end

     0   :  { %s929_s0 = inlined_call_operand.vmem [shape: f32[16,32], index: 0, kind: input, shape index: {}]   ;;  %s930_s1 = inlined_call_operand.vmem [shape: f32[32,59], index: 1, kind: input, shape index: {}]   ;;  %s931_s2 = inlined_call_operand.vmem [shape: f32[1,59], index: 2, kind: input, shape index: {}]   ;;  %s932_s3 = inlined_call_operand.vmem [shape: f32[1,56], index: 3, kind: input, shape index: {}]   ;;  %s933_s4 = inlined_call_operand.vmem [shape: f32[1,56], index: 4, kind: input, shape index: {}]   ;;  %s934_s5 = inlined_call_operand.vmem [shape: f32[56,32], index: 5, kind: input, shape index: {}]   ;;  %s935_s6 = inlined_call_operand.vmem [shape: f32[1,32], index: 6, kind: input, shape index: {}]   ;;  %s936_s7 = inlined_call_operand.vmem [shape: f32[1,32], index: 7, kind: input, shape index: {}]   ;;  %s937_s8 = inlined_call_operand.vmem [shape: f32[1,32], index: 8, kind: input, shape index: {}]   ;;  %s938_s9 = inlined_call_operand.hbm [shape: f32[16,32], index: 9, kind: output, shape index: {}]  }
   0x1   :  { %v38_v0 = vld [vmem:[%s930_s1 + $0x18] sm:$0xff]  ;;  %v37_v1 = vld [vmem:[%s930_s1 + $0x10] sm:$0xff]  ;;  %v36_v2 = vld [vmem:[%s930_s1 + $0x8] sm:$0xff] }
   0x2   :  { %62 = vmatpush.msra.mxu0 %v38_v0  ;;  %520 = vmatpush.msra.mxu3 %v38_v0  ;;  %v35_v3 = vld [vmem:[%s930_s1] sm:$0xff] }
   0x4   :  { %63 = vmatpush.msra.mxu0 %v37_v1  ;;  %521 = vmatpush.msra.mxu3 %v37_v1 }
   0x5   :  { %14 = vsyncpa [#allocation3], 0  ;;  %v33_v4 = vld [vmem:[%s929_s0] sm:$0xff]  ;;  %vm43_vm0 = vcmask 261120   ;;  %v34_v5 = vld [vmem:[%s929_s0 + $0x8] sm:$0xff]  ;;  %s609_s22 = smov 80  }
   0x6   :  { %64 = vmatpush.msra.mxu0 %v36_v2  ;;  %522 = vmatpush.msra.mxu3 %v36_v2  ;;  %v547_v6 = vld [vmem:[%s931_s2] ss:$0 sm:$0xff]  ;;  %vm73_vm1 = vcmask 482752   ;;  %s610_s0 = smov 96   ;;  %vm222_vm2 = vcmask 130048   ;;  %vm308_vm3 = vcmask 64512  }
   0x7   :  { %s611_s2 = smov 72   ;;  %vm94_vm4 = vcmask 23552   ;;  %v612_v50 = vmov 58   ;;  %v613_v51 = vmov 57   ;;  %v614_v52 = vmov 56   ;;  %s620_s23 = smov 8  }
   0x8   :  { %65 = vmatpush.msra.mxu0 %v35_v3  ;;  %523 = vmatpush.msra.mxu3 %v35_v3 }
   0x9   :  { %516 = vmatmul.msk.f32.vlgmr.msra.gmra.mxu0 %vm43_vm0, %v33_v4  ;;  %517 = vmatmul.msk.f32.vlgmr.msra.gmra.mxu3 %vm43_vm0, %v34_v5 }
   0xa   :  { %545 = vset.pattern.permute.xlu0 %v612_v50  ;;  %544 = vset.pattern.permute.xlu1 %v613_v51 }
   0xb   :  { %543 = vset.pattern.permute.xlu2 %v614_v52 }
  0x86   :  { %v67_v7 = vpop.f32.mrf.mxu0 }
  0x87   :  { %v694_v8 = vadd.f32 %v547_v6, %v67_v7 }
  0x89   :  { %302 = vrot.lane.b32.xlu1 %v694_v8, %s609_s22  ;;  %v74_v13 = vsel %vm73_vm1, %v694_v8, -inf  ;;  %v148_v14 = vmul.f32 %v694_v8, %v694_v8  ;;  %v133_v44 = vsel %vm43_vm0, %v694_v8, 0.0 }
  0x8b   :  { %v150_v46 = vsel %vm43_vm0, %v148_v14, 0.0 }
  0x8c   :  { %v70_v9 = vpop.f32.mrf.mxu3 }
  0x8d   :  { %v698_v10 = vadd.f32 %v547_v6, %v70_v9 }
  0x8f   :  { %218 = vrot.lane.b32.xlu2 %v698_v10, %s610_s0  ;;  %v77_v11 = vsel %vm73_vm1, %v698_v10, -inf  ;;  %v149_v12 = vmul.f32 %v698_v10, %v698_v10  ;;  %v136_v31 = vsel %vm43_vm0, %v698_v10, 0.0 }
  0x90   :  { %78 = vmax.xlane.f32.xlu0 %v77_v11 }
  0x91   :  { %326 = vrot.lane.b32.xlu1 %v149_v12, %s609_s22  ;;  %v153_v18 = vsel %vm43_vm0, %v149_v12, 0.0 }
  0x97   :  { %304 = vrot.lane.b32.xlu2 %v698_v10, %s609_s22 }
  0x98   :  { %75 = vmax.xlane.f32.xlu0 %v74_v13 }
  0x9f   :  { %216 = vrot.lane.b32.xlu2 %v694_v8, %s610_s0 }
  0xa7   :  { %240 = vrot.lane.b32.xlu2 %v148_v14, %s610_s0 }
  0xac   :  { %242 = vrot.lane.b32.xlu0 %v149_v12, %s610_s0 }
  0xe9   :  { %v219_v15 = vpop.permute.xlu2 %218 }
  0xea   :  { %v226_v16 = vsel %vm222_vm2, %v219_v15, 0.0 }
  0xeb   :  { %227 = vadd.xlane.f32.xlu2 %v226_v16  ;;  %v615_v16 = vmov 8.0  }
  0xf1   :  { %v305_v17 = vpop.permute.xlu2 %304 }
  0xf2   :  { %v312_v19 = vsel %vm308_vm3, %v305_v17, 0.0  ;;  %v616_v17 = vmov 32.0  }
  0xf3   :  { %154 = vadd.xlane.f32.xlu2 %v153_v18  ;;  %313 = vadd.xlane.f32.xlu0 %v312_v19  ;;  %v617_v18 = vmov 16.0  }
  0xf9   :  { %v217_v34 = vpop.permute.xlu2 %216 }
  0xfa   :  { %v223_v35 = vsel %vm222_vm2, %v217_v34, 0.0 }
  0xfb   :  { %v303_v20 = vpop.permute.xlu1 %302 }
  0xfc   :  { %v309_v41 = vsel %vm308_vm3, %v303_v20, 0.0 }
 0x101   :  { %v241_v36 = vpop.permute.xlu2 %240 }
 0x102   :  { %v246_v37 = vsel %vm222_vm2, %v241_v36, 0.0 }
 0x103   :  { %v79_v21 = vpop.xlane.xlu0 %78  ;;  %v327_v22 = vpop.permute.xlu1 %326 }
 0x104   :  { %v333_v23 = vsel %vm308_vm3, %v327_v22, 0.0  ;;  %v81_v27 = vsub.f32 %v698_v10, %v79_v21 }
 0x105   :  { %334 = vadd.xlane.f32.xlu0 %v333_v23 }
 0x106   :  { %v84_v28 = vmul.f32 1.442695, %v81_v27 }
 0x10b   :  { %v76_v24 = vpop.xlane.xlu0 %75 }
 0x10c   :  { %v80_v25 = vsub.f32 %v694_v8, %v76_v24 }
 0x10e   :  { %v82_v26 = vmul.f32 1.442695, %v80_v25 }
 0x110   :  { %553 = vpow2.f32 %v82_v26 }
 0x111   :  { %555 = vpow2.f32 %v84_v28 }
 0x116   :  { %v717_v29 = vpop.eup %553 }
 0x117   :  { %88 = vrot.lane.b32.xlu1 %v717_v29, %s611_s2  ;;  %v720_v30 = vpop.eup %555 }
 0x11e   :  { %v243_v32 = vpop.permute.xlu0 %242 }
 0x11f   :  { %90 = vrot.lane.b32.xlu1 %v720_v30, %s611_s2  ;;  %v249_v33 = vsel %vm222_vm2, %v243_v32, 0.0  ;;  %s619_s2 = smov 128  }
 0x127   :  { %324 = vrot.lane.b32.xlu1 %v148_v14, %s609_s22 }
 0x151   :  { %137 = vadd.xlane.f32.xlu1 %v136_v31 }
 0x159   :  { %250 = vadd.xlane.f32.xlu1 %v249_v33 }
 0x15e   :  { %v736_v48 = vpop.xlane.xlu2 %227 }
 0x161   :  { %224 = vadd.xlane.f32.xlu1 %v223_v35 }
 0x166   :  { %v734_v47 = vpop.xlane.xlu0 %313  ;;  %v740_v53 = vpop.xlane.xlu2 %154 }
 0x169   :  { %247 = vadd.xlane.f32.xlu1 %v246_v37 }
 0x178   :  { %v738_v49 = vpop.xlane.xlu0 %334 }
 0x189   :  { %v89_v38 = vpop.permute.xlu1 %88 }
 0x18a   :  { %v95_v39 = vsel %vm94_vm4, %v89_v38, 0.0 }
 0x18b   :  { %96 = vadd.xlane.f32.xlu0 %v95_v39 }
 0x191   :  { %v91_v40 = vpop.permute.xlu1 %90 }
 0x192   :  { %v98_v42 = vsel %vm94_vm4, %v91_v40, 0.0 }
 0x193   :  { %310 = vadd.xlane.f32.xlu0 %v309_v41  ;;  %99 = vadd.xlane.f32.xlu2 %v98_v42 }
 0x199   :  { %v325_v43 = vpop.permute.xlu1 %324 }
 0x19a   :  { %v330_v45 = vsel %vm308_vm3, %v325_v43, 0.0 }
 0x19b   :  { %134 = vadd.xlane.f32.xlu2 %v133_v44  ;;  %331 = vadd.xlane.f32.xlu0 %v330_v45 }
 0x1a3   :  { %151 = vadd.xlane.f32.xlu2 %v150_v46 }
 0x1c4   :  { %v138_v20 = vpop.xlane.xlu1 %137 }
 0x1fe   :  { %v97_v54 = vpop.xlane.xlu0 %96 }
 0x1ff   :  { %557 = vrcp.f32 %v97_v54  ;;  %v112_v6 = vand.u32 2147483648, %v97_v54  ;;  %vm106_vm10 = vweird.f32 %v97_v54  ;;  %v110_v11 = vand.u32 2147483647, %v97_v54 }
 0x201   :  { %v113_v13 = vor.u32 1.1754944e-38, %v112_v6  ;;  %vm111_vm12 = vcmp.eq.f32.partialorder %v110_v11, 8.507059e+37 }
 0x205   :  { %v558_v56 = vpop.eup %557 }
 0x206   :  { %v100_v55 = vpop.xlane.xlu2 %99  ;;  %v102_v57 = vmul.f32 %v558_v56, %v97_v54  ;;  %vm107_vm9 = vweird.f32 %v558_v56  ;;  %v311_v43 = vpop.xlane.xlu0 %310 }
 0x207   :  { %559 = vrcp.f32 %v100_v55  ;;  %v127_v62 = vand.u32 2147483648, %v100_v55  ;;  %v125_v1 = vand.u32 2147483647, %v100_v55  ;;  %vm121_vm6 = vweird.f32 %v100_v55  ;;  %vm108_vm11 = vmor %vm106_vm10, %vm107_vm9 }
 0x208   :  { %v103_v59 = vsub.f32 1.0, %v102_v57  ;;  %561 = vrcp.f32 %v615_v16 }
 0x209   :  { %v128_v3 = vor.u32 1.1754944e-38, %v127_v62  ;;  %vm126_vm8 = vcmp.eq.f32.partialorder %v125_v1, 8.507059e+37  ;;  %563 = vrcp.f32 %v616_v17 }
 0x20a   :  { %v104_v63 = vmul.f32 %v558_v56, %v103_v59  ;;  %565 = vrcp.f32 %v617_v18 }
 0x20c   :  { %v105_v5 = vadd.f32 %v558_v56, %v104_v63 }
 0x20d   :  { %v560_v58 = vpop.eup %559 }
 0x20e   :  { %v117_v60 = vmul.f32 %v560_v58, %v100_v55  ;;  %vm122_vm5 = vweird.f32 %v560_v58  ;;  %v109_v12 = vsel %vm108_vm11, %v558_v56, %v105_v5  ;;  %v562_v19 = vpop.eup %561  ;;  %v135_v41 = vpop.xlane.xlu2 %134 }
 0x20f   :  { %vm123_vm7 = vmor %vm121_vm6, %vm122_vm5  ;;  %v114_v14 = vsel %vm111_vm12, %v113_v13, %v109_v12  ;;  %v564_v21 = vpop.eup %563  ;;  %v316_v23 = vmul.f32 8.0, %v562_v19  ;;  %vm320_vm13 = vweird.f32 %v562_v19  ;;  %v397_v13 = vld [vmem:[%s934_s5 + $0x30] sm:$0xff] }
 0x210   :  { %v118_v61 = vsub.f32 1.0, %v117_v60  ;;  %v115_v15 = vmul.f32 %v717_v29, %v114_v14  ;;  %v566_v22 = vpop.eup %565  ;;  %v140_v24 = vmul.f32 32.0, %v564_v21  ;;  %v251_v29 = vpop.xlane.xlu1 %250  ;;  %vm144_vm14 = vweird.f32 %v564_v21  ;;  %524 = vmatpush.msra.mxu2 %v397_v13  ;;  %418 = vmatpush.msra.mxu1 %v397_v13 }
 0x211   :  { %v230_v25 = vmul.f32 16.0, %v566_v22  ;;  %v317_v26 = vsub.f32 1.0, %v316_v23  ;;  %vm234_vm15 = vweird.f32 %v566_v22  ;;  %v332_v60 = vpop.xlane.xlu0 %331  ;;  %v396_v23 = vld [vmem:[%s934_s5 + $0x28] sm:$0xff] }
 0x212   :  { %v119_v0 = vmul.f32 %v560_v58, %v118_v61  ;;  %v141_v27 = vsub.f32 1.0, %v140_v24  ;;  %v395_v24 = vld [vmem:[%s934_s5 + $0x20] sm:$0xff]  ;;  %525 = vmatpush.msra.mxu2 %v396_v23  ;;  %419 = vmatpush.msra.mxu1 %v396_v23 }
 0x213   :  { %v231_v28 = vsub.f32 1.0, %v230_v25 }
 0x214   :  { %v120_v2 = vadd.f32 %v560_v58, %v119_v0  ;;  %v142_v31 = vmul.f32 %v564_v21, %v141_v27  ;;  %526 = vmatpush.msra.mxu2 %v395_v24  ;;  %420 = vmatpush.msra.mxu1 %v395_v24 }
 0x215   :  { %v232_v32 = vmul.f32 %v566_v22, %v231_v28 }
 0x216   :  { %v124_v4 = vsel %vm123_vm7, %v560_v58, %v120_v2  ;;  %v143_v34 = vadd.f32 %v564_v21, %v142_v31 }
 0x217   :  { %v129_v7 = vsel %vm126_vm8, %v128_v3, %v124_v4  ;;  %v233_v35 = vadd.f32 %v566_v22, %v232_v32 }
 0x218   :  { %v130_v9 = vmul.f32 %v720_v30, %v129_v7  ;;  %v318_v30 = vmul.f32 %v562_v19, %v317_v26  ;;  %v744_v37 = vsel %vm144_vm14, %v564_v21, %v143_v34  ;;  %v225_v38 = vpop.xlane.xlu1 %224  ;;  %v394_v26 = vld [vmem:[%s934_s5 + $0x18] sm:$0xff] }
 0x219   :  { %v235_v39 = vsel %vm234_vm15, %v566_v22, %v233_v35  ;;  %v747_v40 = vmul.f32 %v744_v37, %v138_v20  ;;  %v157_v52 = vmul.f32 %v740_v53, %v744_v37  ;;  %v767_v59 = vmul.f32 %v744_v37, %v135_v41  ;;  %527 = vmatpush.msra.mxu2 %v394_v26  ;;  %v392_v35 = vld [vmem:[%s934_s5 + $0x8] sm:$0xff] }
 0x21a   :  { %209 = vperm.xlu2 %543, %v130_v9   ;;  %381 = vperm.xlu0 %545, %v130_v9   ;;  %v319_v33 = vadd.f32 %v562_v19, %v318_v30  ;;  %v753_v44 = vmul.f32 %v235_v39, %v736_v48  ;;  %v253_v51 = vmul.f32 %v251_v29, %v235_v39  ;;  %v393_v29 = vld [vmem:[%s934_s5 + $0x10] sm:$0xff] }
 0x21b   :  { %297 = vperm.xlu1 %544, %v130_v9   ;;  %v159_v46 = vmul.f32 %v747_v40, %v747_v40  ;;  %v764_v57 = vmul.f32 %v235_v39, %v225_v38  ;;  %v158_v4 = vmul.f32 %v767_v59, %v767_v59  ;;  %421 = vmatpush.msra.mxu1 %v394_v26 }
 0x21c   :  { %v321_v36 = vsel %vm320_vm13, %v562_v19, %v319_v33  ;;  %528 = vmatpush.msra.mxu2 %v393_v29  ;;  %v186_v24 = vsub.f32 %v694_v8, %v767_v59 }
 0x21d   :  { %v750_v42 = vmul.f32 %v321_v36, %v734_v47  ;;  %v337_v45 = vmul.f32 %v738_v49, %v321_v36  ;;  %v255_v47 = vmul.f32 %v753_v44, %v753_v44  ;;  %v161_v55 = vsub.f32 %v157_v52, %v159_v46  ;;  %v152_v49 = vpop.xlane.xlu2 %151  ;;  %422 = vmatpush.msra.mxu1 %v393_v29 }
 0x21e   :  { %v769_v63 = vmul.f32 %v321_v36, %v311_v43  ;;  %v156_v0 = vmul.f32 %v152_v49, %v744_v37  ;;  %v254_v1 = vmul.f32 %v764_v57, %v764_v57  ;;  %v336_v2 = vmul.f32 %v332_v60, %v321_v36  ;;  %v391_v36 = vld [vmem:[%s934_s5] sm:$0xff]  ;;  %529 = vmatpush.msra.mxu2 %v392_v35 }
 0x21f   :  { %v257_v56 = vsub.f32 %v253_v51, %v255_v47  ;;  %v163_v61 = vmax.f32 %v161_v55, 0.0  ;;  %423 = vmatpush.msra.mxu1 %v392_v35 }
 0x220   :  { %v248_v48 = vpop.xlane.xlu1 %247  ;;  %v338_v7 = vmul.f32 %v769_v63, %v769_v63  ;;  %v160_v11 = vsub.f32 %v156_v0, %v158_v4  ;;  %530 = vmatpush.msra.mxu2 %v391_v36  ;;  %v367_v0 = vsub.f32 %v698_v10, %v750_v42 }
 0x221   :  { %v252_v62 = vmul.f32 %v248_v48, %v235_v39  ;;  %v259_v53 = vmax.f32 %v257_v56, 0.0  ;;  %v778_v5 = vadd.f32 1e-05, %v163_v61  ;;  %424 = vmatpush.msra.mxu1 %v391_v36 }
 0x222   :  { %204 = vperm.xlu2 %543, %v115_v15   ;;  %v340_v12 = vsub.f32 %v336_v2, %v338_v7  ;;  %v187_v7 = vsub.f32 %v698_v10, %v747_v40 }
 0x223   :  { %293 = vperm.xlu1 %544, %v115_v15   ;;  %v256_v6 = vsub.f32 %v252_v62, %v254_v1  ;;  %v782_v9 = vadd.f32 1e-05, %v259_v53  ;;  %vm182_vm6 = vweird.f32 %v778_v5  ;;  %v550_v62 = vld [vmem:[%s935_s6] ss:$0 sm:$0xff] }
 0x224   :  { %v342_v16 = vmax.f32 %v340_v12, 0.0 }
 0x225   :  { %v258_v14 = vmax.f32 %v256_v6, 0.0  ;;  %vm278_vm8 = vweird.f32 %v782_v9 }
 0x226   :  { %v798_v21 = vadd.f32 1e-05, %v342_v16  ;;  %v549_v16 = vld [vmem:[%s933_s4] ss:$0 sm:$0xff] }
 0x227   :  { %v790_v17 = vadd.f32 1e-05, %v258_v14 }
 0x229   :  { %vm268_vm12 = vweird.f32 %v790_v17 }
 0x22a   :  { %546 = vset.pattern.permute.xlu2 %v612_v50  ;;  %v339_v50 = vmul.f32 %v750_v42, %v750_v42  ;;  %v548_v42 = vld [vmem:[%s932_s3] ss:$0 sm:$0xff] }
 0x22b   :  { %377 = vperm.xlu2 %546, %v115_v15   ;;  %v162_v15 = vmax.f32 %v160_v11, 0.0 }
 0x22c   :  { %v341_v54 = vsub.f32 %v337_v45, %v339_v50 }
 0x22d   :  { %v794_v19 = vadd.f32 1e-05, %v162_v15 }
 0x22e   :  { %v343_v58 = vmax.f32 %v341_v54, 0.0 }
 0x22f   :  { %vm172_vm15 = vweird.f32 %v794_v19 }
 0x230   :  { %v774_v3 = vadd.f32 1e-05, %v343_v58 }
 0x232   :  { %567 = vrsqrt.f32 %v774_v3  ;;  %vm362_vm2 = vweird.f32 %v774_v3 }
 0x233   :  { %569 = vrsqrt.f32 %v778_v5 }
 0x234   :  { %571 = vrsqrt.f32 %v782_v9 }
 0x235   :  { %573 = vrsqrt.f32 %v790_v17 }
 0x236   :  { %575 = vrsqrt.f32 %v794_v19 }
 0x237   :  { %577 = vrsqrt.f32 %v798_v21 }
 0x238   :  { %v792_v18 = vpop.eup %567 }
 0x239   :  { %v796_v20 = vpop.eup %569  ;;  %v357_v25 = vmul.f32 %v792_v18, %v774_v3  ;;  %vm363_vm1 = vweird.f32 %v792_v18 }
 0x23a   :  { %v800_v22 = vpop.eup %571  ;;  %v177_v27 = vmul.f32 %v796_v20, %v778_v5  ;;  %vm183_vm3 = vweird.f32 %v796_v20  ;;  %vm854_vm5 = vmor %vm362_vm2, %vm363_vm1  ;;  %v283_v5 = vsub.f32 %v698_v10, %v753_v44  ;;  %vm352_vm1 = vweird.f32 %v798_v21 }
 0x23b   :  { %v273_v28 = vmul.f32 %v800_v22, %v782_v9  ;;  %v358_v30 = vmul.f32 %v792_v18, %v357_v25  ;;  %v824_v31 = vpop.eup %573  ;;  %vm279_vm4 = vweird.f32 %v800_v22  ;;  %vm184_vm7 = vmor %vm182_vm6, %vm183_vm3 }
 0x23c   :  { %v178_v32 = vmul.f32 %v796_v20, %v177_v27  ;;  %v828_v34 = vpop.eup %575  ;;  %v263_v45 = vmul.f32 %v824_v31, %v790_v17  ;;  %vm280_vm9 = vmor %vm278_vm8, %vm279_vm4  ;;  %vm269_vm10 = vweird.f32 %v824_v31  ;;  %vm388_vm4 = vcmask 392192  }
 0x23d   :  { %v274_v33 = vmul.f32 %v800_v22, %v273_v28  ;;  %v836_v38 = vpop.eup %577  ;;  %v359_v39 = vmul.f32 0.5, %v358_v30  ;;  %v167_v46 = vmul.f32 %v828_v34, %v794_v19  ;;  %vm173_vm11 = vweird.f32 %v828_v34  ;;  %vm881_vm14 = vmor %vm268_vm12, %vm269_vm10 }
 0x23e   :  { %v179_v41 = vmul.f32 0.5, %v178_v32  ;;  %v347_v50 = vmul.f32 %v836_v38, %v798_v21  ;;  %v264_v54 = vmul.f32 %v824_v31, %v263_v45  ;;  %vm353_vm13 = vweird.f32 %v836_v38  ;;  %vm174_vm2 = vmor %vm172_vm15, %vm173_vm11 }
 0x23f   :  { %v275_v43 = vmul.f32 0.5, %v274_v33  ;;  %v360_v51 = vsub.f32 1.5, %v359_v39  ;;  %v168_v55 = vmul.f32 %v828_v34, %v167_v46  ;;  %vm354_vm3 = vmor %vm352_vm1, %vm353_vm13  ;;  %v282_v19 = vsub.f32 %v694_v8, %v764_v57 }
 0x240   :  { %v180_v52 = vsub.f32 1.5, %v179_v41  ;;  %v348_v56 = vmul.f32 %v836_v38, %v347_v50  ;;  %v265_v58 = vmul.f32 0.5, %v264_v54  ;;  %v366_v21 = vsub.f32 %v694_v8, %v769_v63 }
 0x241   :  { %v276_v47 = vsub.f32 1.5, %v275_v43  ;;  %v361_v48 = vmul.f32 %v792_v18, %v360_v51  ;;  %v169_v60 = vmul.f32 0.5, %v168_v55 }
 0x242   :  { %v181_v49 = vmul.f32 %v796_v20, %v180_v52  ;;  %v349_v53 = vmul.f32 0.5, %v348_v56  ;;  %v266_v3 = vsub.f32 1.5, %v265_v58 }
 0x243   :  { %v277_v61 = vmul.f32 %v800_v22, %v276_v47  ;;  %v365_v1 = vsel %vm854_vm5, %v792_v18, %v361_v48  ;;  %v170_v4 = vsub.f32 1.5, %v169_v60  ;;  %vm402_vm5 = vcmask 457728  }
 0x244   :  { %v185_v2 = vsel %vm184_vm7, %v796_v20, %v181_v49  ;;  %v350_v9 = vsub.f32 1.5, %v349_v53  ;;  %v369_v11 = vmul.f32 %v367_v0, %v365_v1  ;;  %v267_v44 = vmul.f32 %v824_v31, %v266_v3 }
 0x245   :  { %v281_v6 = vsel %vm280_vm9, %v800_v22, %v277_v61  ;;  %v189_v12 = vmul.f32 %v187_v7, %v185_v2  ;;  %v171_v15 = vmul.f32 %v828_v34, %v170_v4 }
 0x246   :  { %v285_v14 = vmul.f32 %v283_v5, %v281_v6  ;;  %v351_v10 = vmul.f32 %v836_v38, %v350_v9  ;;  %v371_v18 = vmul.f32 %v548_v42, %v369_v11  ;;  %v271_v23 = vsel %vm881_vm14, %v824_v31, %v267_v44 }
 0x247   :  { %v194_v20 = vmul.f32 %v548_v42, %v189_v12  ;;  %v175_v22 = vsel %vm174_vm2, %v828_v34, %v171_v15  ;;  %v284_v30 = vmul.f32 %v282_v19, %v271_v23 }
 0x248   :  { %v287_v17 = vmul.f32 %v548_v42, %v285_v14  ;;  %v355_v25 = vsel %vm354_vm3, %v836_v38, %v351_v10  ;;  %v373_v26 = vadd.f32 %v549_v16, %v371_v18  ;;  %v188_v28 = vmul.f32 %v186_v24, %v175_v22 }
 0x249   :  { %v199_v27 = vadd.f32 %v549_v16, %v194_v20  ;;  %v368_v32 = vmul.f32 %v366_v21, %v355_v25  ;;  %v286_v39 = vmul.f32 %v548_v42, %v284_v30 }
 0x24a   :  { %v289_v29 = vadd.f32 %v549_v16, %v287_v17  ;;  %v375_v34 = vmax.f32 %v373_v26, 0.0  ;;  %v193_v35 = vmul.f32 %v548_v42, %v188_v28 }
 0x24b   :  { %v201_v31 = vmax.f32 %v199_v27, 0.0  ;;  %v370_v41 = vmul.f32 %v548_v42, %v368_v32  ;;  %v288_v46 = vadd.f32 %v549_v16, %v286_v39 }
 0x24c   :  { %v291_v36 = vmax.f32 %v289_v29, 0.0  ;;  %v198_v8 = vadd.f32 %v549_v16, %v193_v35 }
 0x24d   :  { %v372_v50 = vadd.f32 %v549_v16, %v370_v41  ;;  %v290_v54 = vmax.f32 %v288_v46, 0.0 }
 0x24e   :  { %v200_v52 = vmax.f32 %v198_v8, 0.0 }
 0x24f   :  { %v374_v55 = vmax.f32 %v372_v50, 0.0 }
 0x274   :  { %v210_v13 = vpop.permute.xlu2 %209 }
 0x275   :  { %v213_v38 = vmul.f32 %v210_v13, %v201_v31 }
 0x27c   :  { %v205_v33 = vpop.permute.xlu2 %204 }
 0x27d   :  { %v212_v48 = vmul.f32 %v205_v33, %v200_v52 }
 0x285   :  { %v378_v47 = vpop.permute.xlu2 %377 }
 0x286   :  { %v384_v58 = vmul.f32 %v378_v47, %v374_v55 }
 0x28c   :  { %v382_v57 = vpop.permute.xlu0 %381 }
 0x28d   :  { %v298_v59 = vpop.permute.xlu1 %297  ;;  %v385_v43 = vmul.f32 %v382_v57, %v375_v34 }
 0x28e   :  { %v301_v45 = vmul.f32 %v298_v59, %v291_v36  ;;  %v552_v36 = vld [vmem:[%s937_s8] ss:$0 sm:$0xff]  ;;  %s504_s8 = sshll.u32 %s938_s9, 4  ;;  %s505_s8 = int_to_ptr.hbm [resolvable:$true] %s504_s8 }
 0x290   :  { %v387_v63 = vsel %vm43_vm0, %v213_v38, %v301_v45 }
 0x291   :  { %v390_v51 = vsel %vm388_vm4, %v387_v63, %v385_v43 }
 0x292   :  { %519 = vmatmul.msk.f32.vlgmr.msra.gmra.mxu2 %vm402_vm5, %v390_v51 }
 0x295   :  { %v294_v56 = vpop.permute.xlu1 %293 }
 0x296   :  { %v300_v49 = vmul.f32 %v294_v56, %v290_v54 }
 0x298   :  { %v386_v60 = vsel %vm43_vm0, %v212_v48, %v300_v49 }
 0x299   :  { %v389_v61 = vsel %vm388_vm4, %v386_v60, %v384_v58 }
 0x29a   :  { %518 = vmatmul.msk.f32.vlgmr.msra.gmra.mxu1 %vm402_vm5, %v389_v61 }
 0x315   :  { %v429_v53 = vpop.f32.mrf.mxu2 }
 0x316   :  { %v430_v0 = vadd.f32 %v550_v62, %v429_v53 }
 0x317   :  { %v426_v1 = vpop.f32.mrf.mxu1 }
 0x318   :  { %v427_v2 = vadd.f32 %v550_v62, %v426_v1  ;;  %v437_v3 = vsel %vm43_vm0, %v430_v0, 0.0  ;;  %v443_v7 = vmul.f32 %v430_v0, %v430_v0 }
 0x319   :  { %438 = vadd.xlane.f32.xlu2 %v437_v3 }
 0x31a   :  { %v434_v4 = vsel %vm43_vm0, %v427_v2, 0.0  ;;  %v442_v6 = vmul.f32 %v427_v2, %v427_v2  ;;  %v447_v9 = vsel %vm43_vm0, %v443_v7, 0.0 }
 0x31b   :  { %435 = vadd.xlane.f32.xlu1 %v434_v4 }
 0x31c   :  { %v444_v5 = vsel %vm43_vm0, %v442_v6, 0.0 }
 0x31d   :  { %445 = vadd.xlane.f32.xlu0 %v444_v5 }
 0x323   :  { %448 = vadd.xlane.f32.xlu1 %v447_v9 }
 0x38c   :  { %v439_v12 = vpop.xlane.xlu2 %438 }
 0x38d   :  { %v441_v44 = vmul.f32 %v439_v12, %v744_v37 }
 0x38e   :  { %v436_v42 = vpop.xlane.xlu1 %435 }
 0x38f   :  { %v440_v11 = vmul.f32 %v436_v42, %v744_v37  ;;  %v453_v18 = vmul.f32 %v441_v44, %v441_v44  ;;  %v481_v59 = vsub.f32 %v430_v0, %v441_v44 }
 0x390   :  { %v446_v13 = vpop.xlane.xlu0 %445 }
 0x391   :  { %v452_v14 = vmul.f32 %v440_v11, %v440_v11  ;;  %v450_v15 = vmul.f32 %v446_v13, %v744_v37  ;;  %v480_v33 = vsub.f32 %v427_v2, %v440_v11 }
 0x393   :  { %v454_v10 = vsub.f32 %v450_v15, %v452_v14 }
 0x395   :  { %v456_v40 = vmax.f32 %v454_v10, 0.0 }
 0x396   :  { %v449_v16 = vpop.xlane.xlu1 %448 }
 0x397   :  { %v458_v20 = vadd.f32 1e-05, %v456_v40  ;;  %v451_v17 = vmul.f32 %v449_v16, %v744_v37  ;;  %v551_v37 = vld [vmem:[%s936_s7] ss:$0 sm:$0xff]  ;;  %s618_s7 = smov [#allocation2]  }
 0x398   :  { %s502_s1 = sshll.u32 %s618_s7, 4  ;;  %s503_s1 = int_to_ptr.vmem [resolvable:$true] %s502_s1 }
 0x399   :  { %579 = vrsqrt.f32 %v458_v20  ;;  %v455_v22 = vsub.f32 %v451_v17, %v453_v18  ;;  %vm466_vm7 = vweird.f32 %v458_v20 }
 0x39b   :  { %v457_v23 = vmax.f32 %v455_v22, 0.0 }
 0x39d   :  { %v459_v19 = vadd.f32 1e-05, %v457_v23 }
 0x39f   :  { %v580_v24 = vpop.eup %579  ;;  %581 = vrsqrt.f32 %v459_v19  ;;  %vm476_vm10 = vweird.f32 %v459_v19 }
 0x3a0   :  { %v461_v25 = vmul.f32 %v580_v24, %v458_v20  ;;  %vm467_vm6 = vweird.f32 %v580_v24 }
 0x3a1   :  { %vm468_vm8 = vmor %vm466_vm7, %vm467_vm6 }
 0x3a2   :  { %v462_v21 = vmul.f32 %v580_v24, %v461_v25 }
 0x3a4   :  { %v463_v26 = vmul.f32 0.5, %v462_v21 }
 0x3a5   :  { %v582_v27 = vpop.eup %581 }
 0x3a6   :  { %v464_v28 = vsub.f32 1.5, %v463_v26  ;;  %v471_v29 = vmul.f32 %v582_v27, %v459_v19  ;;  %vm477_vm9 = vweird.f32 %v582_v27 }
 0x3a7   :  { %vm478_vm11 = vmor %vm476_vm10, %vm477_vm9 }
 0x3a8   :  { %v465_v30 = vmul.f32 %v580_v24, %v464_v28  ;;  %v472_v32 = vmul.f32 %v582_v27, %v471_v29 }
 0x3aa   :  { %v469_v34 = vsel %vm468_vm8, %v580_v24, %v465_v30  ;;  %v473_v31 = vmul.f32 0.5, %v472_v32 }
 0x3ab   :  { %v482_v35 = vmul.f32 %v480_v33, %v469_v34 }
 0x3ac   :  { %v474_v57 = vsub.f32 1.5, %v473_v31 }
 0x3ad   :  { %v487_v39 = vmul.f32 %v551_v37, %v482_v35 }
 0x3ae   :  { %v475_v41 = vmul.f32 %v582_v27, %v474_v57 }
 0x3af   :  { %v492_v43 = vadd.f32 %v552_v36, %v487_v39 }
 0x3b0   :  { %v479_v38 = vsel %vm478_vm11, %v582_v27, %v475_v41 }
 0x3b1   :  { %v483_v45 = vmul.f32 %v481_v59, %v479_v38  ;;  %v494_v8 = vmax.f32 %v492_v43, 0.0 }
 0x3b3   :  { %v488_v63 = vmul.f32 %v551_v37, %v483_v45  ;;  %496 = vst.msk [vmem:[#allocation2] sm:$0xff] %vm43_vm0, %v494_v8 }
 0x3b5   :  { %v493_v46 = vadd.f32 %v552_v36, %v488_v63 }
 0x3b7   :  { %v495_v50 = vmax.f32 %v493_v46, 0.0 }
 0x3b9   :  { %497 = vst.msk [vmem:[#allocation2 + $0x8] sm:$0xff] %vm43_vm0, %v495_v50 }
 0x3ba   :  { %510 = dma.vmem_to_hbm [thread:$0]  %s503_s1, 256, %s505_s8, [#allocation3], %s619_s2, %s619_s2, %s620_s23  }
 0x3bb   :  { %607 = dma.done.wait [#allocation3], 256  }
 0x3bc   :  { %608 = vsyncadd [#allocation3], 4294967040 }
 0x3bd   :  { %515 = vsyncpa [#allocation3], 1 }

</bundles_post_ra>
